<compile_context>
chip_gen: v7x
topology: tpu7x:2x2x1
jax: 0.10.0
libtpu: 0.0.40
codegen_flags: <defaults>
</compile_context>

<pallas_src>
import functools

import jax
import jax.numpy as jnp
from jax.experimental import pallas as pl
from jax.experimental.pallas import tpu as pltpu


def _round_up(x, m):
    return (x + m - 1) // m * m


def _ln(x, g, b, eps):
    """LayerNorm over the last dim, f32 statistics."""
    mean = jnp.mean(x, axis=-1, keepdims=True)
    xc = x - mean
    var = jnp.mean(xc * xc, axis=-1, keepdims=True)
    return xc * jax.lax.rsqrt(var + eps) * g + b


# ------------------------------ fused kernel -------------------------------

def _vit_fused_kernel(
        xp_ref, pw_ref, clspos_ref, posb_ref,
        n1g_ref, n1b_ref, qkvwT_ref, qkvbc_ref, projw_ref, projb_ref,
        n2g_ref, n2b_ref, fc1w_ref, fc1b_ref, fc2w_ref, fc2b_ref,
        ng_ref, nb_ref, wlm_ref, asq_ref, mod_ref, wc_ref,
        o_ref, xs_ref,
        *, nh, hd, eps, two_inv_temp, inv_hw, hw, k1, ncls, num_prefix,
        rows, lanes):
    li = pl.program_id(1)
    d = nh * hd

    # ---- (1) patch embed + cls token + pos embed (first depth step only) ---
    @pl.when(li == 0)
    def _():
        tok = jnp.dot(xp_ref[0].astype(jnp.bfloat16), pw_ref[...],
                      preferred_element_type=jnp.float32) + posb_ref[...]
        xs_ref[0:num_prefix, :] = clspos_ref[...]      # no concatenate
        xs_ref[num_prefix:, :] = tok

    # ---- (2) transformer block `li` (runs every step) ----------------------
    x = xs_ref[...]                                    # (S, D) resident in VMEM
    s_len = x.shape[0]

    h = _ln(x, n1g_ref[0], n1b_ref[0], eps)
    # QKV in transposed (3D, S) layout; attention scale pre-folded into Q rows.
    qkvT = jax.lax.dot_general(
        qkvwT_ref[0], h.astype(jnp.bfloat16),
        (((1,), (1,)), ((), ())),
        preferred_element_type=jnp.float32) + qkvbc_ref[0]           # (3D, S)
    qkv3 = qkvT.reshape(3 * nh, hd, s_len)             # leading-dim split only
    q3 = qkv3[0:nh]                                    # (nh, hd, S)
    k3 = qkv3[nh:2 * nh]
    v3 = qkv3[2 * nh:3 * nh]
    qT = jnp.swapaxes(q3, 1, 2)                        # (nh, S, hd)
    # batched (head-leading) attention matmuls -- no per-head loop / concat
    s_att = jnp.einsum('hqc,hck->hqk', qT.astype(jnp.bfloat16),
                       k3.astype(jnp.bfloat16),
                       preferred_element_type=jnp.float32)           # (nh,S,S)
    s_att = s_att - jnp.max(s_att, axis=-1, keepdims=True)
    e = jnp.exp(s_att)
    p = e * pl.reciprocal(jnp.sum(e, axis=-1, keepdims=True), approx=True)
    oT = jnp.einsum('hck,hqk->hcq', v3.astype(jnp.bfloat16),
                    p.astype(jnp.bfloat16),
                    preferred_element_type=jnp.float32)              # (nh,hd,S)
    attn = jnp.transpose(oT.reshape(d, s_len))                        # (S, D)
    attn = jnp.dot(attn.astype(jnp.bfloat16), projw_ref[0],
                   preferred_element_type=jnp.float32) + projb_ref[0]
    x = x + attn

    h2 = _ln(x, n2g_ref[0], n2b_ref[0], eps)
    h2 = jnp.dot(h2.astype(jnp.bfloat16), fc1w_ref[0],
                 preferred_element_type=jnp.float32) + fc1b_ref[0]
    # TODO(synk): torch nn.GELU defaults to exact erf; tanh approximation here.
    h2 = jax.nn.gelu(h2, approximate=True)
    h2 = jnp.dot(h2.astype(jnp.bfloat16), fc2w_ref[0],
                 preferred_element_type=jnp.float32) + fc2b_ref[0]
    x = x + h2
    xs_ref[...] = x

    # ---- (3) final norm + landmark head (last depth step only) -------------
    @pl.when(li == pl.num_programs(1) - 1)
    def _():
        xn = _ln(x, ng_ref[...], nb_ref[...], eps)
        xpatch = xn[num_prefix:, :]                                   # (HW, D)
        # fc_landmarks (1x1 conv), part-major layout (tiny, keep f32 for fidelity)
        ab = jax.lax.dot_general(wlm_ref[...], xpatch,
                                 (((1,), (1,)), ((), ())),
                                 preferred_element_type=jnp.float32)  # (K1,HW)
        # part_logits = -(|x|^2 - 2*ab + |w|^2); |x|^2 is constant over parts
        # so it cancels in the part softmax.  2/temp and |w|^2/temp are folded.
        logits = ab * two_inv_temp - asq_ref[...]
        logits = logits - jnp.max(logits, axis=0, keepdims=True)
        e2 = jnp.exp(logits)
        maps = e2 / jnp.sum(e2, axis=0, keepdims=True)   # exact divide (output)
        feat = jnp.dot(maps, xpatch,
                       preferred_element_type=jnp.float32) * inv_hw   # (K1, D)
        feat_mod = feat * mod_ref[...]                   # 'original' modulation
        scores = jax.lax.dot_general(wc_ref[...], feat_mod[0:k1 - 1, :],
                                     (((1,), (1,)), ((), ())),
                                     preferred_element_type=jnp.float32)  # (C,K)
        # TODO(synk): gumbel_softmax_straight_through_custom is not defined in
        # the reference source; eval-mode approximation: fg/bg grouping of the
        # part softmax + straight-through one-hot (no gumbel noise / dropout).
        fg = jnp.sum(maps[0:k1 - 1, :], axis=0, keepdims=True)        # (1, HW)
        bg = maps[k1 - 1:k1, :]                                        # (1, HW)
        fg_sel = (fg >= bg).astype(jnp.float32)

        # Lane-dense packed output slab (single 128-multiple-wide block).
        o_ref[0] = jnp.zeros((rows, lanes), jnp.float32)
        o_ref[0, 0:k1, 0:hw] = ab
        o_ref[0, 0:k1, hw:2 * hw] = maps
        o_ref[0, 0:1, 2 * hw:3 * hw] = fg_sel
        o_ref[0, 1:2, 2 * hw:3 * hw] = 1.0 - fg_sel
        o_ref[0, 2:3, 2 * hw:3 * hw] = fg
        o_ref[0, 3:4, 2 * hw:3 * hw] = bg
        o_ref[0, 0:k1, 3 * hw:3 * hw + d] = feat_mod
        o_ref[0, 0:ncls, 3 * hw + d:3 * hw + d + (k1 - 1)] = scores


# -------------------------------- wrapper ----------------------------------

_BF16 = jnp.bfloat16


def _const_spec(shape):
    nd = len(shape)
    return pl.BlockSpec(tuple(shape), lambda bi, li, _n=nd: (0,) * _n)


def _batch_spec(shape):
    nd = len(shape)
    return pl.BlockSpec((1,) + tuple(shape),
                        lambda bi, li, _n=nd: (bi,) + (0,) * _n)


def _layer_spec(shape):
    nd = len(shape)
    return pl.BlockSpec((1,) + tuple(shape),
                        lambda bi, li, _n=nd: (li,) + (0,) * _n)


def forward(params, cfg, x_nchw):
    b = x_nchw.shape[0]
    patch = cfg["patch"]
    c_in = cfg["in_chans"]
    d = cfg["dim"]
    nh = cfg["heads"]
    hd = d // nh
    depth = cfg["depth"]
    hidden = params["blocks"][0]["fc1_w"].shape[1]
    k = cfg["num_landmarks"]
    k1 = k + 1
    ncls = cfg["num_classes"]
    hf = cfg["img"] // patch
    wf = hf
    n = hf * wf
    hw = n
    s = n + 1
    cpp = c_in * patch * patch
    inv_temp = 1.0 / cfg["softmax_temperature"]

    # ---- host-side prep: folded constants + depth-stacked weights ----------
    # patch_embed Conv2d(C, D, kernel=stride=patch) == patchify + matmul.
    # TODO(synk): the NCHW->patch transpose is a standalone XLA copy (few KiB).
    xp = x_nchw.reshape(b, c_in, hf, patch, wf, patch)
    xp = xp.transpose(0, 2, 4, 1, 3, 5).reshape(b, n, cpp)

    cls_pos = params["cls_token"][0] + params["pos_embed"][0, :1, :]    # (1,D)
    pos_b = params["pos_embed"][0, 1:, :] + params["patch_b"][None, :]  # (N,D)
    patch_w = params["patch_w"].astype(_BF16)

    blocks = params["blocks"]
    scale = hd ** -0.5
    # fold attention scale into the Q rows of the pre-transposed QKV weights
    qcol = jnp.concatenate([jnp.full((d,), scale, jnp.float32),
                            jnp.ones((2 * d,), jnp.float32)])
    qkv_wT = jnp.stack([(blk["qkv_w"] * qcol[None, :]).T
                        for blk in blocks]).astype(_BF16)           # (L, 3D, D)
    qkv_bc = jnp.stack([(blk["qkv_b"] * qcol).reshape(3 * d, 1)
                        for blk in blocks])                          # (L, 3D, 1)

    def stack_row(key, w):
        return jnp.stack([blk[key].reshape(1, w) for blk in blocks])  # (L,1,w)

    n1_g = stack_row("n1_g", d)
    n1_b = stack_row("n1_b", d)
    n2_g = stack_row("n2_g", d)
    n2_b = stack_row("n2_b", d)
    proj_b = stack_row("proj_b", d)
    fc1_b = stack_row("fc1_b", hidden)
    fc2_b = stack_row("fc2_b", d)
    proj_w = jnp.stack([blk["proj_w"] for blk in blocks]).astype(_BF16)
    fc1_w = jnp.stack([blk["fc1_w"] for blk in blocks]).astype(_BF16)
    fc2_w = jnp.stack([blk["fc2_w"] for blk in blocks]).astype(_BF16)

    w_lm = params["fc_landmarks_w"]                                  # (K1, D)
    a_sq = jnp.sum(w_lm * w_lm, axis=1, keepdims=True) * inv_temp    # (K1, 1)
    mod_kd = params["modulation"].T                                  # (K1, D)
    wc = params["fc_class_w"]                                        # (C, D)
    norm_g = params["norm_g"].reshape(1, d)
    norm_b = params["norm_b"].reshape(1, d)

    rows = _round_up(max(k1, 4, ncls), 8)
    lanes = _round_up(3 * hw + d + k, 128)

    kern = functools.partial(
        _vit_fused_kernel, nh=nh, hd=hd, eps=1e-6,
        two_inv_temp=2.0 * inv_temp, inv_hw=1.0 / hw, hw=hw, k1=k1,
        ncls=ncls, num_prefix=1, rows=rows, lanes=lanes)

    in_specs = [
        _batch_spec((n, cpp)),        # xp
        _const_spec((cpp, d)),        # patch_w
        _const_spec((1, d)),          # cls_pos
        _const_spec((n, d)),          # pos_b
        _layer_spec((1, d)),          # n1_g
        _layer_spec((1, d)),          # n1_b
        _layer_spec((3 * d, d)),      # qkv_wT
        _layer_spec((3 * d, 1)),      # qkv_bc
        _layer_spec((d, d)),          # proj_w
        _layer_spec((1, d)),          # proj_b
        _layer_spec((1, d)),          # n2_g
        _layer_spec((1, d)),          # n2_b
        _layer_spec((d, hidden)),     # fc1_w
        _layer_spec((1, hidden)),     # fc1_b
        _layer_spec((hidden, d)),     # fc2_w
        _layer_spec((1, d)),          # fc2_b
        _const_spec((1, d)),          # norm_g
        _const_spec((1, d)),          # norm_b
        _const_spec((k1, d)),         # w_lm
        _const_spec((k1, 1)),         # a_sq (pre-scaled by 1/temp)
        _const_spec((k1, d)),         # modulation (K1, D)
        _const_spec((ncls, d)),       # classifier weight
    ]

    slab = pl.pallas_call(
        kern,
        grid=(b, depth),
        in_specs=in_specs,
        out_specs=pl.BlockSpec((1, rows, lanes), lambda bi, li: (bi, 0, 0)),
        out_shape=jax.ShapeDtypeStruct((b, rows, lanes), jnp.float32),
        scratch_shapes=[pltpu.VMEM((s, d), jnp.float32)],
        compiler_params=pltpu.CompilerParams(
            dimension_semantics=("parallel", "arbitrary")),
    )(xp, patch_w, cls_pos, pos_b,
      n1_g, n1_b, qkv_wT, qkv_bc, proj_w, proj_b, n2_g, n2_b,
      fc1_w, fc1_b, fc2_w, fc2_b,
      norm_g, norm_b, w_lm, a_sq, mod_kd, wc)

    # ---- unpack the lane-dense slab (cheap slices / reshapes only) ---------
    ab = slab[:, :k1, 0:hw].reshape(b, k1, hf, wf)
    maps = slab[:, :k1, hw:2 * hw].reshape(b, k1, hf, wf)
    fg_hard = slab[:, 0:2, 2 * hw:3 * hw].reshape(b, 2, hf, wf)
    fg_soft = slab[:, 2:4, 2 * hw:3 * hw].reshape(b, 2, hf, wf)
    feat_mod = jnp.swapaxes(slab[:, :k1, 3 * hw:3 * hw + d], 1, 2)   # (B,D,K1)
    scores = slab[:, :ncls, 3 * hw + d:3 * hw + d + k]               # (B,C,K)
    # (all_features_mod, maps, maps_fg_bg, scores, ab)
    return feat_mod, maps, (fg_hard, fg_soft), scores, ab


# ------------------------------- parameters --------------------------------

def init_params(key, *, img=16, patch=4, in_chans=3, dim=32, depth=2, heads=4,
                mlp_ratio=4, num_landmarks=8, num_classes=16):
    keys = iter(jax.random.split(key, 64))

    def nrm(shape, std=0.02):
        return std * jax.random.normal(next(keys), shape, dtype=jnp.float32)

    n_patch = (img // patch) ** 2
    k1 = num_landmarks + 1
    hidden = dim * mlp_ratio
    params = {
        "patch_w": nrm((in_chans * patch * patch, dim)),
        "patch_b": jnp.zeros((dim,), jnp.float32),
        "cls_token": nrm((1, 1, dim)),
        "pos_embed": nrm((1, n_patch + 1, dim)),
        "norm_g": jnp.ones((dim,), jnp.float32),
        "norm_b": jnp.zeros((dim,), jnp.float32),
        # fc_landmarks: Conv2d(dim, K+1, 1, bias=False).weight stored (K+1, D)
        "fc_landmarks_w": nrm((k1, dim)),
        # modulation_type == 'original': Parameter(ones(1, D, K+1))
        "modulation": jnp.ones((dim, k1), jnp.float32),
        # classifier_type == 'linear': Linear(D, num_classes, bias=False)
        "fc_class_w": nrm((num_classes, dim)),
        "blocks": [],
    }
    for _ in range(depth):
        params["blocks"].append({
            "n1_g": jnp.ones((dim,), jnp.float32),
            "n1_b": jnp.zeros((dim,), jnp.float32),
            "qkv_w": nrm((dim, 3 * dim)),
            "qkv_b": jnp.zeros((3 * dim,), jnp.float32),
            "proj_w": nrm((dim, dim)),
            "proj_b": jnp.zeros((dim,), jnp.float32),
            "n2_g": jnp.ones((dim,), jnp.float32),
            "n2_b": jnp.zeros((dim,), jnp.float32),
            "fc1_w": nrm((dim, hidden)),
            "fc1_b": jnp.zeros((hidden,), jnp.float32),
            "fc2_w": nrm((hidden, dim)),
            "fc2_b": jnp.zeros((dim,), jnp.float32),
        })
    cfg = dict(img=img, patch=patch, in_chans=in_chans, dim=dim, depth=depth,
               heads=heads, num_landmarks=num_landmarks,
               num_classes=num_classes, softmax_temperature=1.0)
    return params, cfg


if __name__ == "__main__":
    key = jax.random.PRNGKey(0)
    kp, kx = jax.random.split(key)
    params, cfg = init_params(kp)
    x = jax.random.normal(
        kx, (2, cfg["in_chans"], cfg["img"], cfg["img"]), dtype=jnp.float32)

    fwd = jax.jit(lambda prm, inp: forward(prm, cfg, inp))
    all_features_mod, maps, maps_fg_bg, scores, ab = jax.block_until_ready(
        fwd(params, x))

    k1 = cfg["num_landmarks"] + 1
    assert all_features_mod.shape == (2, cfg["dim"], k1)
    assert maps.shape == (2, k1, 4, 4)
    assert maps_fg_bg[0].shape == (2, 2, 4, 4)
    assert maps_fg_bg[1].shape == (2, 2, 4, 4)
    assert scores.shape == (2, cfg["num_classes"], cfg["num_landmarks"])
    assert ab.shape == (2, k1, 4, 4)
    assert bool(jnp.all(jnp.isfinite(scores)))
    assert bool(jnp.all(jnp.isfinite(all_features_mod)))
    assert bool(jnp.all(jnp.isfinite(ab)))
    # part softmax (exact divide) must be normalized over the part axis
    maps_sum = jnp.sum(maps, axis=1)
    assert bool(jnp.all(jnp.abs(maps_sum - 1.0) < 2e-3))
    print("KERNEL_OK")
</pallas_src>

<mosaic_0001>
module attributes {stable_mosaic.version = 11 : i64} {
  func.func @_vit_fused_kernel(%arg0: i32, %arg1: i32, %arg2: memref<1x16x48xf32, #tpu.memory_space<vmem>>, %arg3: memref<48x32xbf16, #tpu.memory_space<vmem>>, %arg4: memref<1x32xf32, #tpu.memory_space<vmem>>, %arg5: memref<16x32xf32, #tpu.memory_space<vmem>>, %arg6: memref<1x1x32xf32, #tpu.memory_space<vmem>>, %arg7: memref<1x1x32xf32, #tpu.memory_space<vmem>>, %arg8: memref<1x96x32xbf16, #tpu.memory_space<vmem>>, %arg9: memref<1x96x1xf32, #tpu.memory_space<vmem>>, %arg10: memref<1x32x32xbf16, #tpu.memory_space<vmem>>, %arg11: memref<1x1x32xf32, #tpu.memory_space<vmem>>, %arg12: memref<1x1x32xf32, #tpu.memory_space<vmem>>, %arg13: memref<1x1x32xf32, #tpu.memory_space<vmem>>, %arg14: memref<1x32x128xbf16, #tpu.memory_space<vmem>>, %arg15: memref<1x1x128xf32, #tpu.memory_space<vmem>>, %arg16: memref<1x128x32xbf16, #tpu.memory_space<vmem>>, %arg17: memref<1x1x32xf32, #tpu.memory_space<vmem>>, %arg18: memref<1x32xf32, #tpu.memory_space<vmem>>, %arg19: memref<1x32xf32, #tpu.memory_space<vmem>>, %arg20: memref<9x32xf32, #tpu.memory_space<vmem>>, %arg21: memref<9x1xf32, #tpu.memory_space<vmem>>, %arg22: memref<9x32xf32, #tpu.memory_space<vmem>>, %arg23: memref<16x32xf32, #tpu.memory_space<vmem>>, %arg24: memref<1x16x128xf32, #tpu.memory_space<vmem>>, %arg25: memref<17x32xf32, #tpu.memory_space<vmem>>) attributes {dimension_semantics = [#tpu.dimension_semantics<parallel>, #tpu.dimension_semantics<arbitrary>], iteration_bounds = array<i64: 2, 2>, scalar_prefetch = 0 : i64, scratch_operands = 1 : i64, tpu.core_type = #tpu.core_type<tc>, window_params = [{transform_indices = @transform_0, window_bounds = array<i64: 1, 16, 48>}, {pipeline_mode = #tpu.pipeline_mode<synchronous>, transform_indices = @transform_1, window_bounds = array<i64: 48, 32>}, {pipeline_mode = #tpu.pipeline_mode<synchronous>, transform_indices = @transform_2, window_bounds = array<i64: 1, 32>}, {pipeline_mode = #tpu.pipeline_mode<synchronous>, transform_indices = @transform_3, window_bounds = array<i64: 16, 32>}, {transform_indices = @transform_4, window_bounds = array<i64: 1, 1, 32>}, {transform_indices = @transform_5, window_bounds = array<i64: 1, 1, 32>}, {transform_indices = @transform_6, window_bounds = array<i64: 1, 96, 32>}, {transform_indices = @transform_7, window_bounds = array<i64: 1, 96, 1>}, {transform_indices = @transform_8, window_bounds = array<i64: 1, 32, 32>}, {transform_indices = @transform_9, window_bounds = array<i64: 1, 1, 32>}, {transform_indices = @transform_10, window_bounds = array<i64: 1, 1, 32>}, {transform_indices = @transform_11, window_bounds = array<i64: 1, 1, 32>}, {transform_indices = @transform_12, window_bounds = array<i64: 1, 32, 128>}, {transform_indices = @transform_13, window_bounds = array<i64: 1, 1, 128>}, {transform_indices = @transform_14, window_bounds = array<i64: 1, 128, 32>}, {transform_indices = @transform_15, window_bounds = array<i64: 1, 1, 32>}, {pipeline_mode = #tpu.pipeline_mode<synchronous>, transform_indices = @transform_16, window_bounds = array<i64: 1, 32>}, {pipeline_mode = #tpu.pipeline_mode<synchronous>, transform_indices = @transform_17, window_bounds = array<i64: 1, 32>}, {pipeline_mode = #tpu.pipeline_mode<synchronous>, transform_indices = @transform_18, window_bounds = array<i64: 9, 32>}, {pipeline_mode = #tpu.pipeline_mode<synchronous>, transform_indices = @transform_19, window_bounds = array<i64: 9, 1>}, {pipeline_mode = #tpu.pipeline_mode<synchronous>, transform_indices = @transform_20, window_bounds = array<i64: 9, 32>}, {pipeline_mode = #tpu.pipeline_mode<synchronous>, transform_indices = @transform_21, window_bounds = array<i64: 16, 32>}, {transform_indices = @transform_22, window_bounds = array<i64: 1, 16, 128>}]} {
    %c0_i32 = arith.constant 0 : i32
    %0 = arith.cmpi eq, %arg1, %c0_i32 : i32
    %1 = arith.extui %0 : i1 to i32
    %c0_i32_0 = arith.constant 0 : i32
    %2 = arith.cmpi ne, %1, %c0_i32_0 : i32
    scf.if %2 {
      %c0_62 = arith.constant 0 : index
      %c0_63 = arith.constant 0 : index
      %c0_64 = arith.constant 0 : index
      %126 = vector.load %arg2[%c0_62, %c0_63, %c0_64] : memref<1x16x48xf32, #tpu.memory_space<vmem>>, vector<1x16x48xf32>
      %127 = vector.shape_cast %126 : vector<1x16x48xf32> to vector<16x48xf32>
      %128 = arith.truncf %127 : vector<16x48xf32> to vector<16x48xbf16>
      %c0_65 = arith.constant 0 : index
      %c0_66 = arith.constant 0 : index
      %129 = vector.load %arg3[%c0_65, %c0_66] : memref<48x32xbf16, #tpu.memory_space<vmem>>, vector<48x32xbf16>
      %cst_67 = arith.constant dense<0.000000e+00> : vector<16x32xf32>
      %130 = tpu.matmul %128, %129, %cst_67 {dimension_numbers = #tpu.dot_dimension_numbers<[1], [0], [0], [1], [0, 0, 1, 1], [], []>} : vector<16x48xbf16>, vector<48x32xbf16>, vector<16x32xf32> -> vector<16x32xf32>
      %c0_68 = arith.constant 0 : index
      %c0_69 = arith.constant 0 : index
      %131 = vector.load %arg5[%c0_68, %c0_69] : memref<16x32xf32, #tpu.memory_space<vmem>>, vector<16x32xf32>
      %132 = arith.addf %130, %131 : vector<16x32xf32>
      %c0_70 = arith.constant 0 : index
      %c0_71 = arith.constant 0 : index
      %133 = vector.load %arg4[%c0_70, %c0_71] : memref<1x32xf32, #tpu.memory_space<vmem>>, vector<1x32xf32>
      %c0_72 = arith.constant 0 : index
      %c0_73 = arith.constant 0 : index
      %134 = vector.load %arg25[%c0_72, %c0_73] : memref<17x32xf32, #tpu.memory_space<vmem>>, vector<1x32xf32>
      tpu.vector_store %arg25[%c0_72, %c0_73], %133 {strides = array<i32>} : memref<17x32xf32, #tpu.memory_space<vmem>>, vector<1x32xf32>,
      %c1 = arith.constant 1 : index
      %c0_74 = arith.constant 0 : index
      %135 = vector.load %arg25[%c1, %c0_74] : memref<17x32xf32, #tpu.memory_space<vmem>>, vector<16x32xf32>
      tpu.vector_store %arg25[%c1, %c0_74], %132 {strides = array<i32>} : memref<17x32xf32, #tpu.memory_space<vmem>>, vector<16x32xf32>,
    } else {
    }
    %c0 = arith.constant 0 : index
    %c0_1 = arith.constant 0 : index
    %3 = vector.load %arg25[%c0, %c0_1] : memref<17x32xf32, #tpu.memory_space<vmem>>, vector<17x32xf32>
    %c0_2 = arith.constant 0 : index
    %c0_3 = arith.constant 0 : index
    %c0_4 = arith.constant 0 : index
    %4 = vector.load %arg6[%c0_2, %c0_3, %c0_4] : memref<1x1x32xf32, #tpu.memory_space<vmem>>, vector<1x1x32xf32>
    %5 = vector.shape_cast %4 : vector<1x1x32xf32> to vector<1x32xf32>
    %c0_5 = arith.constant 0 : index
    %c0_6 = arith.constant 0 : index
    %c0_7 = arith.constant 0 : index
    %6 = vector.load %arg7[%c0_5, %c0_6, %c0_7] : memref<1x1x32xf32, #tpu.memory_space<vmem>>, vector<1x1x32xf32>
    %7 = vector.shape_cast %6 : vector<1x1x32xf32> to vector<1x32xf32>
    %cst = arith.constant dense<0.000000e+00> : vector<17xf32>
    %8 = vector.multi_reduction <add>, %3, %cst [1] : vector<17x32xf32> to vector<17xf32>
    %9 = vector.shape_cast %8 : vector<17xf32> to vector<17x1xf32>
    %cst_8 = arith.constant 3.200000e+01 : f32
    %10 = vector.broadcast %cst_8 : f32 to vector<17x1xf32>
    %11 = arith.divf %9, %10 : vector<17x1xf32>
    %12 = vector.broadcast %11 : vector<17x1xf32> to vector<17x32xf32>
    %13 = arith.subf %3, %12 : vector<17x32xf32>
    %14 = arith.mulf %13, %13 : vector<17x32xf32>
    %cst_9 = arith.constant dense<0.000000e+00> : vector<17xf32>
    %15 = vector.multi_reduction <add>, %14, %cst_9 [1] : vector<17x32xf32> to vector<17xf32>
    %16 = vector.shape_cast %15 : vector<17xf32> to vector<17x1xf32>
    %cst_10 = arith.constant 3.200000e+01 : f32
    %17 = vector.broadcast %cst_10 : f32 to vector<17x1xf32>
    %18 = arith.divf %16, %17 : vector<17x1xf32>
    %cst_11 = arith.constant 9.99999997E-7 : f32
    %19 = vector.broadcast %cst_11 : f32 to vector<17x1xf32>
    %20 = arith.addf %18, %19 : vector<17x1xf32>
    %21 = math.rsqrt %20 : vector<17x1xf32>
    %22 = vector.broadcast %21 : vector<17x1xf32> to vector<17x32xf32>
    %23 = arith.mulf %13, %22 : vector<17x32xf32>
    %24 = vector.broadcast %5 : vector<1x32xf32> to vector<17x32xf32>
    %25 = arith.mulf %23, %24 : vector<17x32xf32>
    %26 = vector.broadcast %7 : vector<1x32xf32> to vector<17x32xf32>
    %27 = arith.addf %25, %26 : vector<17x32xf32>
    %c0_12 = arith.constant 0 : index
    %c0_13 = arith.constant 0 : index
    %c0_14 = arith.constant 0 : index
    %28 = vector.load %arg8[%c0_12, %c0_13, %c0_14] : memref<1x96x32xbf16, #tpu.memory_space<vmem>>, vector<1x96x32xbf16>
    %29 = vector.shape_cast %28 : vector<1x96x32xbf16> to vector<96x32xbf16>
    %30 = arith.truncf %27 : vector<17x32xf32> to vector<17x32xbf16>
    %cst_15 = arith.constant dense<0.000000e+00> : vector<96x17xf32>
    %31 = tpu.matmul %29, %30, %cst_15 {dimension_numbers = #tpu.dot_dimension_numbers<[1], [1], [0], [0], [0, 0, 1, 0], [], []>} : vector<96x32xbf16>, vector<17x32xbf16>, vector<96x17xf32> -> vector<96x17xf32>
    %c0_16 = arith.constant 0 : index
    %c0_17 = arith.constant 0 : index
    %c0_18 = arith.constant 0 : index
    %32 = vector.load %arg9[%c0_16, %c0_17, %c0_18] : memref<1x96x1xf32, #tpu.memory_space<vmem>>, vector<1x96x1xf32>
    %33 = vector.shape_cast %32 : vector<1x96x1xf32> to vector<96x1xf32>
    %34 = vector.broadcast %33 : vector<96x1xf32> to vector<96x17xf32>
    %35 = arith.addf %31, %34 : vector<96x17xf32>
    %36 = vector.shape_cast %35 : vector<96x17xf32> to vector<12x8x17xf32>
    %37 = vector.extract_strided_slice %36 {offsets = [0, 0, 0], sizes = [4, 8, 17], strides = [1, 1, 1]} : vector<12x8x17xf32> to vector<4x8x17xf32>
    %38 = vector.extract_strided_slice %36 {offsets = [4, 0, 0], sizes = [4, 8, 17], strides = [1, 1, 1]} : vector<12x8x17xf32> to vector<4x8x17xf32>
    %39 = vector.extract_strided_slice %36 {offsets = [8, 0, 0], sizes = [4, 8, 17], strides = [1, 1, 1]} : vector<12x8x17xf32> to vector<4x8x17xf32>
    %40 = tpu.transpose %37, [0, 2, 1] : vector<4x8x17xf32> -> vector<4x17x8xf32>
    %41 = arith.truncf %40 : vector<4x17x8xf32> to vector<4x17x8xbf16>
    %42 = arith.truncf %38 : vector<4x8x17xf32> to vector<4x8x17xbf16>
    "tpu.trace_start"() <{level = 10 : i32, message = "hqc,hck->hqk"}> : () -> ()
    %cst_19 = arith.constant dense<0.000000e+00> : vector<4x17x17xf32>
    %43 = tpu.matmul %41, %42, %cst_19 {dimension_numbers = #tpu.dot_dimension_numbers<[2], [1], [1], [2], [0, 0, 0, 1, 1, 2], [0], [0]>} : vector<4x17x8xbf16>, vector<4x8x17xbf16>, vector<4x17x17xf32> -> vector<4x17x17xf32>
    "tpu.trace_stop"() : () -> ()
    %cst_20 = arith.constant dense<0xFF800000> : vector<4x17xf32>
    %44 = vector.multi_reduction <maximumf>, %43, %cst_20 [2] : vector<4x17x17xf32> to vector<4x17xf32>
    %45 = vector.shape_cast %44 : vector<4x17xf32> to vector<4x17x1xf32>
    %46 = vector.broadcast %45 : vector<4x17x1xf32> to vector<4x17x17xf32>
    %47 = arith.subf %43, %46 : vector<4x17x17xf32>
    %48 = math.exp %47 : vector<4x17x17xf32>
    %cst_21 = arith.constant dense<0.000000e+00> : vector<4x17xf32>
    %49 = vector.multi_reduction <add>, %48, %cst_21 [2] : vector<4x17x17xf32> to vector<4x17xf32>
    %50 = vector.shape_cast %49 : vector<4x17xf32> to vector<4x17x1xf32>
    %51 = tpu.reciprocal %50 {approx = true} : vector<4x17x1xf32> -> vector<4x17x1xf32>
    %52 = vector.broadcast %51 : vector<4x17x1xf32> to vector<4x17x17xf32>
    %53 = arith.mulf %48, %52 : vector<4x17x17xf32>
    %54 = arith.truncf %39 : vector<4x8x17xf32> to vector<4x8x17xbf16>
    %55 = arith.truncf %53 : vector<4x17x17xf32> to vector<4x17x17xbf16>
    "tpu.trace_start"() <{level = 10 : i32, message = "hck,hqk->hcq"}> : () -> ()
    %cst_22 = arith.constant dense<0.000000e+00> : vector<4x8x17xf32>
    %56 = tpu.matmul %54, %55, %cst_22 {dimension_numbers = #tpu.dot_dimension_numbers<[2], [2], [1], [1], [0, 0, 0, 1, 1, 1], [0], [0]>} : vector<4x8x17xbf16>, vector<4x17x17xbf16>, vector<4x8x17xf32> -> vector<4x8x17xf32>
    "tpu.trace_stop"() : () -> ()
    %57 = vector.shape_cast %56 : vector<4x8x17xf32> to vector<32x17xf32>
    %58 = tpu.transpose %57, [1, 0] : vector<32x17xf32> -> vector<17x32xf32>
    %59 = arith.truncf %58 : vector<17x32xf32> to vector<17x32xbf16>
    %c0_23 = arith.constant 0 : index
    %c0_24 = arith.constant 0 : index
    %c0_25 = arith.constant 0 : index
    %60 = vector.load %arg10[%c0_23, %c0_24, %c0_25] : memref<1x32x32xbf16, #tpu.memory_space<vmem>>, vector<1x32x32xbf16>
    %61 = vector.shape_cast %60 : vector<1x32x32xbf16> to vector<32x32xbf16>
    %cst_26 = arith.constant dense<0.000000e+00> : vector<17x32xf32>
    %62 = tpu.matmul %59, %61, %cst_26 {dimension_numbers = #tpu.dot_dimension_numbers<[1], [0], [0], [1], [0, 0, 1, 1], [], []>} : vector<17x32xbf16>, vector<32x32xbf16>, vector<17x32xf32> -> vector<17x32xf32>
    %c0_27 = arith.constant 0 : index
    %c0_28 = arith.constant 0 : index
    %c0_29 = arith.constant 0 : index
    %63 = vector.load %arg11[%c0_27, %c0_28, %c0_29] : memref<1x1x32xf32, #tpu.memory_space<vmem>>, vector<1x1x32xf32>
    %64 = vector.shape_cast %63 : vector<1x1x32xf32> to vector<1x32xf32>
    %65 = vector.broadcast %64 : vector<1x32xf32> to vector<17x32xf32>
    %66 = arith.addf %62, %65 : vector<17x32xf32>
    %67 = arith.addf %3, %66 : vector<17x32xf32>
    %c0_30 = arith.constant 0 : index
    %c0_31 = arith.constant 0 : index
    %c0_32 = arith.constant 0 : index
    %68 = vector.load %arg12[%c0_30, %c0_31, %c0_32] : memref<1x1x32xf32, #tpu.memory_space<vmem>>, vector<1x1x32xf32>
    %69 = vector.shape_cast %68 : vector<1x1x32xf32> to vector<1x32xf32>
    %c0_33 = arith.constant 0 : index
    %c0_34 = arith.constant 0 : index
    %c0_35 = arith.constant 0 : index
    %70 = vector.load %arg13[%c0_33, %c0_34, %c0_35] : memref<1x1x32xf32, #tpu.memory_space<vmem>>, vector<1x1x32xf32>
    %71 = vector.shape_cast %70 : vector<1x1x32xf32> to vector<1x32xf32>
    %cst_36 = arith.constant dense<0.000000e+00> : vector<17xf32>
    %72 = vector.multi_reduction <add>, %67, %cst_36 [1] : vector<17x32xf32> to vector<17xf32>
    %73 = vector.shape_cast %72 : vector<17xf32> to vector<17x1xf32>
    %cst_37 = arith.constant 3.200000e+01 : f32
    %74 = vector.broadcast %cst_37 : f32 to vector<17x1xf32>
    %75 = arith.divf %73, %74 : vector<17x1xf32>
    %76 = vector.broadcast %75 : vector<17x1xf32> to vector<17x32xf32>
    %77 = arith.subf %67, %76 : vector<17x32xf32>
    %78 = arith.mulf %77, %77 : vector<17x32xf32>
    %cst_38 = arith.constant dense<0.000000e+00> : vector<17xf32>
    %79 = vector.multi_reduction <add>, %78, %cst_38 [1] : vector<17x32xf32> to vector<17xf32>
    %80 = vector.shape_cast %79 : vector<17xf32> to vector<17x1xf32>
    %cst_39 = arith.constant 3.200000e+01 : f32
    %81 = vector.broadcast %cst_39 : f32 to vector<17x1xf32>
    %82 = arith.divf %80, %81 : vector<17x1xf32>
    %cst_40 = arith.constant 9.99999997E-7 : f32
    %83 = vector.broadcast %cst_40 : f32 to vector<17x1xf32>
    %84 = arith.addf %82, %83 : vector<17x1xf32>
    %85 = math.rsqrt %84 : vector<17x1xf32>
    %86 = vector.broadcast %85 : vector<17x1xf32> to vector<17x32xf32>
    %87 = arith.mulf %77, %86 : vector<17x32xf32>
    %88 = vector.broadcast %69 : vector<1x32xf32> to vector<17x32xf32>
    %89 = arith.mulf %87, %88 : vector<17x32xf32>
    %90 = vector.broadcast %71 : vector<1x32xf32> to vector<17x32xf32>
    %91 = arith.addf %89, %90 : vector<17x32xf32>
    %92 = arith.truncf %91 : vector<17x32xf32> to vector<17x32xbf16>
    %c0_41 = arith.constant 0 : index
    %c0_42 = arith.constant 0 : index
    %c0_43 = arith.constant 0 : index
    %93 = vector.load %arg14[%c0_41, %c0_42, %c0_43] : memref<1x32x128xbf16, #tpu.memory_space<vmem>>, vector<1x32x128xbf16>
    %94 = vector.shape_cast %93 : vector<1x32x128xbf16> to vector<32x128xbf16>
    %cst_44 = arith.constant dense<0.000000e+00> : vector<17x128xf32>
    %95 = tpu.matmul %92, %94, %cst_44 {dimension_numbers = #tpu.dot_dimension_numbers<[1], [0], [0], [1], [0, 0, 1, 1], [], []>} : vector<17x32xbf16>, vector<32x128xbf16>, vector<17x128xf32> -> vector<17x128xf32>
    %c0_45 = arith.constant 0 : index
    %c0_46 = arith.constant 0 : index
    %c0_47 = arith.constant 0 : index
    %96 = vector.load %arg15[%c0_45, %c0_46, %c0_47] : memref<1x1x128xf32, #tpu.memory_space<vmem>>, vector<1x1x128xf32>
    %97 = vector.shape_cast %96 : vector<1x1x128xf32> to vector<1x128xf32>
    %98 = vector.broadcast %97 : vector<1x128xf32> to vector<17x128xf32>
    %99 = arith.addf %95, %98 : vector<17x128xf32>
    %100 = arith.mulf %99, %99 : vector<17x128xf32>
    %101 = arith.mulf %99, %100 : vector<17x128xf32>
    %cst_48 = arith.constant 4.471500e-02 : f32
    %102 = vector.broadcast %cst_48 : f32 to vector<17x128xf32>
    %103 = arith.mulf %102, %101 : vector<17x128xf32>
    %104 = arith.addf %99, %103 : vector<17x128xf32>
    %cst_49 = arith.constant 0.797884583 : f32
    %105 = vector.broadcast %cst_49 : f32 to vector<17x128xf32>
    %106 = arith.mulf %105, %104 : vector<17x128xf32>
    %107 = math.tanh %106 : vector<17x128xf32>
    %cst_50 = arith.constant 1.000000e+00 : f32
    %108 = vector.broadcast %cst_50 : f32 to vector<17x128xf32>
    %109 = arith.addf %108, %107 : vector<17x128xf32>
    %cst_51 = arith.constant 5.000000e-01 : f32
    %110 = vector.broadcast %cst_51 : f32 to vector<17x128xf32>
    %111 = arith.mulf %110, %109 : vector<17x128xf32>
    %112 = arith.mulf %99, %111 : vector<17x128xf32>
    %113 = arith.truncf %112 : vector<17x128xf32> to vector<17x128xbf16>
    %c0_52 = arith.constant 0 : index
    %c0_53 = arith.constant 0 : index
    %c0_54 = arith.constant 0 : index
    %114 = vector.load %arg16[%c0_52, %c0_53, %c0_54] : memref<1x128x32xbf16, #tpu.memory_space<vmem>>, vector<1x128x32xbf16>
    %115 = vector.shape_cast %114 : vector<1x128x32xbf16> to vector<128x32xbf16>
    %cst_55 = arith.constant dense<0.000000e+00> : vector<17x32xf32>
    %116 = tpu.matmul %113, %115, %cst_55 {dimension_numbers = #tpu.dot_dimension_numbers<[1], [0], [0], [1], [0, 0, 1, 1], [], []>} : vector<17x128xbf16>, vector<128x32xbf16>, vector<17x32xf32> -> vector<17x32xf32>
    %c0_56 = arith.constant 0 : index
    %c0_57 = arith.constant 0 : index
    %c0_58 = arith.constant 0 : index
    %117 = vector.load %arg17[%c0_56, %c0_57, %c0_58] : memref<1x1x32xf32, #tpu.memory_space<vmem>>, vector<1x1x32xf32>
    %118 = vector.shape_cast %117 : vector<1x1x32xf32> to vector<1x32xf32>
    %119 = vector.broadcast %118 : vector<1x32xf32> to vector<17x32xf32>
    %120 = arith.addf %116, %119 : vector<17x32xf32>
    %121 = arith.addf %67, %120 : vector<17x32xf32>
    %c0_59 = arith.constant 0 : index
    %c0_60 = arith.constant 0 : index
    %122 = vector.load %arg25[%c0_59, %c0_60] : memref<17x32xf32, #tpu.memory_space<vmem>>, vector<17x32xf32>
    tpu.vector_store %arg25[%c0_59, %c0_60], %121 {strides = array<i32>} : memref<17x32xf32, #tpu.memory_space<vmem>>, vector<17x32xf32>,
    %c1_i32 = arith.constant 1 : i32
    %123 = arith.cmpi eq, %arg1, %c1_i32 : i32
    %124 = arith.extui %123 : i1 to i32
    %c0_i32_61 = arith.constant 0 : i32
    %125 = arith.cmpi ne, %124, %c0_i32_61 : i32
    scf.if %125 {
      %c0_62 = arith.constant 0 : index
      %c0_63 = arith.constant 0 : index
      %126 = vector.load %arg18[%c0_62, %c0_63] : memref<1x32xf32, #tpu.memory_space<vmem>>, vector<1x32xf32>
      %c0_64 = arith.constant 0 : index
      %c0_65 = arith.constant 0 : index
      %127 = vector.load %arg19[%c0_64, %c0_65] : memref<1x32xf32, #tpu.memory_space<vmem>>, vector<1x32xf32>
      %cst_66 = arith.constant dense<0.000000e+00> : vector<17xf32>
      %128 = vector.multi_reduction <add>, %121, %cst_66 [1] : vector<17x32xf32> to vector<17xf32>
      %129 = vector.shape_cast %128 : vector<17xf32> to vector<17x1xf32>
      %cst_67 = arith.constant 3.200000e+01 : f32
      %130 = vector.broadcast %cst_67 : f32 to vector<17x1xf32>
      %131 = arith.divf %129, %130 : vector<17x1xf32>
      %132 = vector.broadcast %131 : vector<17x1xf32> to vector<17x32xf32>
      %133 = arith.subf %121, %132 : vector<17x32xf32>
      %134 = arith.mulf %133, %133 : vector<17x32xf32>
      %cst_68 = arith.constant dense<0.000000e+00> : vector<17xf32>
      %135 = vector.multi_reduction <add>, %134, %cst_68 [1] : vector<17x32xf32> to vector<17xf32>
      %136 = vector.shape_cast %135 : vector<17xf32> to vector<17x1xf32>
      %cst_69 = arith.constant 3.200000e+01 : f32
      %137 = vector.broadcast %cst_69 : f32 to vector<17x1xf32>
      %138 = arith.divf %136, %137 : vector<17x1xf32>
      %cst_70 = arith.constant 9.99999997E-7 : f32
      %139 = vector.broadcast %cst_70 : f32 to vector<17x1xf32>
      %140 = arith.addf %138, %139 : vector<17x1xf32>
      %141 = math.rsqrt %140 : vector<17x1xf32>
      %142 = vector.broadcast %141 : vector<17x1xf32> to vector<17x32xf32>
      %143 = arith.mulf %133, %142 : vector<17x32xf32>
      %144 = vector.broadcast %126 : vector<1x32xf32> to vector<17x32xf32>
      %145 = arith.mulf %143, %144 : vector<17x32xf32>
      %146 = vector.broadcast %127 : vector<1x32xf32> to vector<17x32xf32>
      %147 = arith.addf %145, %146 : vector<17x32xf32>
      %148 = vector.extract_strided_slice %147 {offsets = [1, 0], sizes = [16, 32], strides = [1, 1]} : vector<17x32xf32> to vector<16x32xf32>
      %c0_71 = arith.constant 0 : index
      %c0_72 = arith.constant 0 : index
      %149 = vector.load %arg20[%c0_71, %c0_72] : memref<9x32xf32, #tpu.memory_space<vmem>>, vector<9x32xf32>
      %cst_73 = arith.constant dense<0.000000e+00> : vector<9x16xf32>
      %150 = tpu.matmul %149, %148, %cst_73 {dimension_numbers = #tpu.dot_dimension_numbers<[1], [1], [0], [0], [0, 0, 1, 0], [], []>} : vector<9x32xf32>, vector<16x32xf32>, vector<9x16xf32> -> vector<9x16xf32>
      %cst_74 = arith.constant 2.000000e+00 : f32
      %151 = vector.broadcast %cst_74 : f32 to vector<9x16xf32>
      %152 = arith.mulf %150, %151 : vector<9x16xf32>
      %c0_75 = arith.constant 0 : index
      %c0_76 = arith.constant 0 : index
      %153 = vector.load %arg21[%c0_75, %c0_76] : memref<9x1xf32, #tpu.memory_space<vmem>>, vector<9x1xf32>
      %154 = vector.broadcast %153 : vector<9x1xf32> to vector<9x16xf32>
      %155 = arith.subf %152, %154 : vector<9x16xf32>
      %cst_77 = arith.constant dense<0xFF800000> : vector<16xf32>
      %156 = vector.multi_reduction <maximumf>, %155, %cst_77 [0] : vector<9x16xf32> to vector<16xf32>
      %157 = vector.shape_cast %156 : vector<16xf32> to vector<1x16xf32>
      %158 = vector.broadcast %157 : vector<1x16xf32> to vector<9x16xf32>
      %159 = arith.subf %155, %158 : vector<9x16xf32>
      %160 = math.exp %159 : vector<9x16xf32>
      %cst_78 = arith.constant dense<0.000000e+00> : vector<16xf32>
      %161 = vector.multi_reduction <add>, %160, %cst_78 [0] : vector<9x16xf32> to vector<16xf32>
      %162 = vector.shape_cast %161 : vector<16xf32> to vector<1x16xf32>
      %163 = vector.broadcast %162 : vector<1x16xf32> to vector<9x16xf32>
      %164 = arith.divf %160, %163 : vector<9x16xf32>
      %cst_79 = arith.constant dense<0.000000e+00> : vector<9x32xf32>
      %165 = tpu.matmul %164, %148, %cst_79 {dimension_numbers = #tpu.dot_dimension_numbers<[1], [0], [0], [1], [0, 0, 1, 1], [], []>} : vector<9x16xf32>, vector<16x32xf32>, vector<9x32xf32> -> vector<9x32xf32>
      %cst_80 = arith.constant 6.250000e-02 : f32
      %166 = vector.broadcast %cst_80 : f32 to vector<9x32xf32>
      %167 = arith.mulf %165, %166 : vector<9x32xf32>
      %c0_81 = arith.constant 0 : index
      %c0_82 = arith.constant 0 : index
      %168 = vector.load %arg22[%c0_81, %c0_82] : memref<9x32xf32, #tpu.memory_space<vmem>>, vector<9x32xf32>
      %169 = arith.mulf %167, %168 : vector<9x32xf32>
      %c0_83 = arith.constant 0 : index
      %c0_84 = arith.constant 0 : index
      %170 = vector.load %arg23[%c0_83, %c0_84] : memref<16x32xf32, #tpu.memory_space<vmem>>, vector<16x32xf32>
      %171 = vector.extract_strided_slice %169 {offsets = [0, 0], sizes = [8, 32], strides = [1, 1]} : vector<9x32xf32> to vector<8x32xf32>
      %cst_85 = arith.constant dense<0.000000e+00> : vector<16x8xf32>
      %172 = tpu.matmul %170, %171, %cst_85 {dimension_numbers = #tpu.dot_dimension_numbers<[1], [1], [0], [0], [0, 0, 1, 0], [], []>} : vector<16x32xf32>, vector<8x32xf32>, vector<16x8xf32> -> vector<16x8xf32>
      %173 = vector.extract_strided_slice %164 {offsets = [0, 0], sizes = [8, 16], strides = [1, 1]} : vector<9x16xf32> to vector<8x16xf32>
      %cst_86 = arith.constant dense<0.000000e+00> : vector<16xf32>
      %174 = vector.multi_reduction <add>, %173, %cst_86 [0] : vector<8x16xf32> to vector<16xf32>
      %175 = vector.shape_cast %174 : vector<16xf32> to vector<1x16xf32>
      %176 = vector.extract_strided_slice %164 {offsets = [8, 0], sizes = [1, 16], strides = [1, 1]} : vector<9x16xf32> to vector<1x16xf32>
      %177 = arith.cmpf oge, %175, %176 : vector<1x16xf32>
      %178 = arith.extui %177 : vector<1x16xi1> to vector<1x16xi32>
      %179 = arith.sitofp %178 : vector<1x16xi32> to vector<1x16xf32>
      %cst_87 = arith.constant 0.000000e+00 : f32
      %180 = vector.broadcast %cst_87 : f32 to vector<16x128xf32>
      %c0_88 = arith.constant 0 : index
      %c0_89 = arith.constant 0 : index
      %c0_90 = arith.constant 0 : index
      %181 = vector.load %arg24[%c0_88, %c0_89, %c0_90] : memref<1x16x128xf32, #tpu.memory_space<vmem>>, vector<1x16x128xf32>
      %182 = vector.shape_cast %181 : vector<1x16x128xf32> to vector<16x128xf32>
      %183 = vector.shape_cast %180 : vector<16x128xf32> to vector<1x16x128xf32>
      tpu.vector_store %arg24[%c0_88, %c0_89, %c0_90], %183 {strides = array<i32>} : memref<1x16x128xf32, #tpu.memory_space<vmem>>, vector<1x16x128xf32>,
      %c0_91 = arith.constant 0 : index
      %c0_92 = arith.constant 0 : index
      %c0_93 = arith.constant 0 : index
      %184 = vector.load %arg24[%c0_91, %c0_92, %c0_93] : memref<1x16x128xf32, #tpu.memory_space<vmem>>, vector<1x9x16xf32>
      %185 = vector.shape_cast %184 : vector<1x9x16xf32> to vector<9x16xf32>
      %186 = vector.shape_cast %150 : vector<9x16xf32> to vector<1x9x16xf32>
      tpu.vector_store %arg24[%c0_91, %c0_92, %c0_93], %186 {strides = array<i32>} : memref<1x16x128xf32, #tpu.memory_space<vmem>>, vector<1x9x16xf32>,
      %c0_94 = arith.constant 0 : index
      %c0_95 = arith.constant 0 : index
      %c16 = arith.constant 16 : index
      %187 = vector.load %arg24[%c0_94, %c0_95, %c16] : memref<1x16x128xf32, #tpu.memory_space<vmem>>, vector<1x9x16xf32>
      %188 = vector.shape_cast %187 : vector<1x9x16xf32> to vector<9x16xf32>
      %189 = vector.shape_cast %164 : vector<9x16xf32> to vector<1x9x16xf32>
      tpu.vector_store %arg24[%c0_94, %c0_95, %c16], %189 {strides = array<i32>} : memref<1x16x128xf32, #tpu.memory_space<vmem>>, vector<1x9x16xf32>,
      %c0_96 = arith.constant 0 : index
      %c0_97 = arith.constant 0 : index
      %c32 = arith.constant 32 : index
      %190 = vector.load %arg24[%c0_96, %c0_97, %c32] : memref<1x16x128xf32, #tpu.memory_space<vmem>>, vector<1x1x16xf32>
      %191 = vector.shape_cast %190 : vector<1x1x16xf32> to vector<1x16xf32>
      %192 = vector.shape_cast %179 : vector<1x16xf32> to vector<1x1x16xf32>
      tpu.vector_store %arg24[%c0_96, %c0_97, %c32], %192 {strides = array<i32>} : memref<1x16x128xf32, #tpu.memory_space<vmem>>, vector<1x1x16xf32>,
      %cst_98 = arith.constant 1.000000e+00 : f32
      %193 = vector.broadcast %cst_98 : f32 to vector<1x16xf32>
      %194 = arith.subf %193, %179 : vector<1x16xf32>
      %c0_99 = arith.constant 0 : index
      %c1 = arith.constant 1 : index
      %c32_100 = arith.constant 32 : index
      %195 = vector.load %arg24[%c0_99, %c1, %c32_100] : memref<1x16x128xf32, #tpu.memory_space<vmem>>, vector<1x1x16xf32>
      %196 = vector.shape_cast %195 : vector<1x1x16xf32> to vector<1x16xf32>
      %197 = vector.shape_cast %194 : vector<1x16xf32> to vector<1x1x16xf32>
      tpu.vector_store %arg24[%c0_99, %c1, %c32_100], %197 {strides = array<i32>} : memref<1x16x128xf32, #tpu.memory_space<vmem>>, vector<1x1x16xf32>,
      %c0_101 = arith.constant 0 : index
      %c2 = arith.constant 2 : index
      %c32_102 = arith.constant 32 : index
      %198 = vector.load %arg24[%c0_101, %c2, %c32_102] : memref<1x16x128xf32, #tpu.memory_space<vmem>>, vector<1x1x16xf32>
      %199 = vector.shape_cast %198 : vector<1x1x16xf32> to vector<1x16xf32>
      %200 = vector.shape_cast %175 : vector<1x16xf32> to vector<1x1x16xf32>
      tpu.vector_store %arg24[%c0_101, %c2, %c32_102], %200 {strides = array<i32>} : memref<1x16x128xf32, #tpu.memory_space<vmem>>, vector<1x1x16xf32>,
      %c0_103 = arith.constant 0 : index
      %c3 = arith.constant 3 : index
      %c32_104 = arith.constant 32 : index
      %201 = vector.load %arg24[%c0_103, %c3, %c32_104] : memref<1x16x128xf32, #tpu.memory_space<vmem>>, vector<1x1x16xf32>
      %202 = vector.shape_cast %201 : vector<1x1x16xf32> to vector<1x16xf32>
      %203 = vector.shape_cast %176 : vector<1x16xf32> to vector<1x1x16xf32>
      tpu.vector_store %arg24[%c0_103, %c3, %c32_104], %203 {strides = array<i32>} : memref<1x16x128xf32, #tpu.memory_space<vmem>>, vector<1x1x16xf32>,
      %c0_105 = arith.constant 0 : index
      %c0_106 = arith.constant 0 : index
      %c48 = arith.constant 48 : index
      %204 = vector.load %arg24[%c0_105, %c0_106, %c48] : memref<1x16x128xf32, #tpu.memory_space<vmem>>, vector<1x9x32xf32>
      %205 = vector.shape_cast %204 : vector<1x9x32xf32> to vector<9x32xf32>
      %206 = vector.shape_cast %169 : vector<9x32xf32> to vector<1x9x32xf32>
      tpu.vector_store %arg24[%c0_105, %c0_106, %c48], %206 {strides = array<i32>} : memref<1x16x128xf32, #tpu.memory_space<vmem>>, vector<1x9x32xf32>,
      %c0_107 = arith.constant 0 : index
      %c0_108 = arith.constant 0 : index
      %c80 = arith.constant 80 : index
      %207 = vector.load %arg24[%c0_107, %c0_108, %c80] : memref<1x16x128xf32, #tpu.memory_space<vmem>>, vector<1x16x8xf32>
      %208 = vector.shape_cast %207 : vector<1x16x8xf32> to vector<16x8xf32>
      %209 = vector.shape_cast %172 : vector<16x8xf32> to vector<1x16x8xf32>
      tpu.vector_store %arg24[%c0_107, %c0_108, %c80], %209 {strides = array<i32>} : memref<1x16x128xf32, #tpu.memory_space<vmem>>, vector<1x16x8xf32>,
    } else {
    }
    return
  }
  func.func @transform_0(%arg0: i32, %arg1: i32) -> (i32, i32, i32) {
    %c0_i32 = arith.constant 0 : i32
    %c0_i32_0 = arith.constant 0 : i32
    %c0_i32_1 = arith.constant 0 : i32
    return %arg0, %c0_i32, %c0_i32_0 : i32, i32, i32
  }
  func.func @transform_1(%arg0: i32, %arg1: i32) -> (i32, i32) {
    %c0_i32 = arith.constant 0 : i32
    %c0_i32_0 = arith.constant 0 : i32
    %c0_i32_1 = arith.constant 0 : i32
    return %c0_i32, %c0_i32_0 : i32, i32
  }
  func.func @transform_2(%arg0: i32, %arg1: i32) -> (i32, i32) {
    %c0_i32 = arith.constant 0 : i32
    %c0_i32_0 = arith.constant 0 : i32
    %c0_i32_1 = arith.constant 0 : i32
    return %c0_i32, %c0_i32_0 : i32, i32
  }
  func.func @transform_3(%arg0: i32, %arg1: i32) -> (i32, i32) {
    %c0_i32 = arith.constant 0 : i32
    %c0_i32_0 = arith.constant 0 : i32
    %c0_i32_1 = arith.constant 0 : i32
    return %c0_i32, %c0_i32_0 : i32, i32
  }
  func.func @transform_4(%arg0: i32, %arg1: i32) -> (i32, i32, i32) {
    %c0_i32 = arith.constant 0 : i32
    %c0_i32_0 = arith.constant 0 : i32
    %c0_i32_1 = arith.constant 0 : i32
    return %arg1, %c0_i32, %c0_i32_0 : i32, i32, i32
  }
  func.func @transform_5(%arg0: i32, %arg1: i32) -> (i32, i32, i32) {
    %c0_i32 = arith.constant 0 : i32
    %c0_i32_0 = arith.constant 0 : i32
    %c0_i32_1 = arith.constant 0 : i32
    return %arg1, %c0_i32, %c0_i32_0 : i32, i32, i32
  }
  func.func @transform_6(%arg0: i32, %arg1: i32) -> (i32, i32, i32) {
    %c0_i32 = arith.constant 0 : i32
    %c0_i32_0 = arith.constant 0 : i32
    %c0_i32_1 = arith.constant 0 : i32
    return %arg1, %c0_i32, %c0_i32_0 : i32, i32, i32
  }
  func.func @transform_7(%arg0: i32, %arg1: i32) -> (i32, i32, i32) {
    %c0_i32 = arith.constant 0 : i32
    %c0_i32_0 = arith.constant 0 : i32
    %c0_i32_1 = arith.constant 0 : i32
    return %arg1, %c0_i32, %c0_i32_0 : i32, i32, i32
  }
  func.func @transform_8(%arg0: i32, %arg1: i32) -> (i32, i32, i32) {
    %c0_i32 = arith.constant 0 : i32
    %c0_i32_0 = arith.constant 0 : i32
    %c0_i32_1 = arith.constant 0 : i32
    return %arg1, %c0_i32, %c0_i32_0 : i32, i32, i32
  }
  func.func @transform_9(%arg0: i32, %arg1: i32) -> (i32, i32, i32) {
    %c0_i32 = arith.constant 0 : i32
    %c0_i32_0 = arith.constant 0 : i32
    %c0_i32_1 = arith.constant 0 : i32
    return %arg1, %c0_i32, %c0_i32_0 : i32, i32, i32
  }
  func.func @transform_10(%arg0: i32, %arg1: i32) -> (i32, i32, i32) {
    %c0_i32 = arith.constant 0 : i32
    %c0_i32_0 = arith.constant 0 : i32
    %c0_i32_1 = arith.constant 0 : i32
    return %arg1, %c0_i32, %c0_i32_0 : i32, i32, i32
  }
  func.func @transform_11(%arg0: i32, %arg1: i32) -> (i32, i32, i32) {
    %c0_i32 = arith.constant 0 : i32
    %c0_i32_0 = arith.constant 0 : i32
    %c0_i32_1 = arith.constant 0 : i32
    return %arg1, %c0_i32, %c0_i32_0 : i32, i32, i32
  }
  func.func @transform_12(%arg0: i32, %arg1: i32) -> (i32, i32, i32) {
    %c0_i32 = arith.constant 0 : i32
    %c0_i32_0 = arith.constant 0 : i32
    %c0_i32_1 = arith.constant 0 : i32
    return %arg1, %c0_i32, %c0_i32_0 : i32, i32, i32
  }
  func.func @transform_13(%arg0: i32, %arg1: i32) -> (i32, i32, i32) {
    %c0_i32 = arith.constant 0 : i32
    %c0_i32_0 = arith.constant 0 : i32
    %c0_i32_1 = arith.constant 0 : i32
    return %arg1, %c0_i32, %c0_i32_0 : i32, i32, i32
  }
  func.func @transform_14(%arg0: i32, %arg1: i32) -> (i32, i32, i32) {
    %c0_i32 = arith.constant 0 : i32
    %c0_i32_0 = arith.constant 0 : i32
    %c0_i32_1 = arith.constant 0 : i32
    return %arg1, %c0_i32, %c0_i32_0 : i32, i32, i32
  }
  func.func @transform_15(%arg0: i32, %arg1: i32) -> (i32, i32, i32) {
    %c0_i32 = arith.constant 0 : i32
    %c0_i32_0 = arith.constant 0 : i32
    %c0_i32_1 = arith.constant 0 : i32
    return %arg1, %c0_i32, %c0_i32_0 : i32, i32, i32
  }
  func.func @transform_16(%arg0: i32, %arg1: i32) -> (i32, i32) {
    %c0_i32 = arith.constant 0 : i32
    %c0_i32_0 = arith.constant 0 : i32
    %c0_i32_1 = arith.constant 0 : i32
    return %c0_i32, %c0_i32_0 : i32, i32
  }
  func.func @transform_17(%arg0: i32, %arg1: i32) -> (i32, i32) {
    %c0_i32 = arith.constant 0 : i32
    %c0_i32_0 = arith.constant 0 : i32
    %c0_i32_1 = arith.constant 0 : i32
    return %c0_i32, %c0_i32_0 : i32, i32
  }
  func.func @transform_18(%arg0: i32, %arg1: i32) -> (i32, i32) {
    %c0_i32 = arith.constant 0 : i32
    %c0_i32_0 = arith.constant 0 : i32
    %c0_i32_1 = arith.constant 0 : i32
    return %c0_i32, %c0_i32_0 : i32, i32
  }
  func.func @transform_19(%arg0: i32, %arg1: i32) -> (i32, i32) {
    %c0_i32 = arith.constant 0 : i32
    %c0_i32_0 = arith.constant 0 : i32
    %c0_i32_1 = arith.constant 0 : i32
    return %c0_i32, %c0_i32_0 : i32, i32
  }
  func.func @transform_20(%arg0: i32, %arg1: i32) -> (i32, i32) {
    %c0_i32 = arith.constant 0 : i32
    %c0_i32_0 = arith.constant 0 : i32
    %c0_i32_1 = arith.constant 0 : i32
    return %c0_i32, %c0_i32_0 : i32, i32
  }
  func.func @transform_21(%arg0: i32, %arg1: i32) -> (i32, i32) {
    %c0_i32 = arith.constant 0 : i32
    %c0_i32_0 = arith.constant 0 : i32
    %c0_i32_1 = arith.constant 0 : i32
    return %c0_i32, %c0_i32_0 : i32, i32
  }
  func.func @transform_22(%arg0: i32, %arg1: i32) -> (i32, i32, i32) {
    %c0_i32 = arith.constant 0 : i32
    %c0_i32_0 = arith.constant 0 : i32
    %c0_i32_1 = arith.constant 0 : i32
    return %arg0, %c0_i32, %c0_i32_0 : i32, i32, i32
  }
}

</mosaic_0001>

<bundles_post_ra>
// kernel: _lambda_.1
= control target key start
LH: loop header
LB: loop body
LE: loop exit
PB: predicated region body
PF: predicated region fallthrough
CT: control target
= control target key end

     0   :  { %s3649_s28 = smov 0   ;;  %s3651_s29 = smov 0   ;;  %s4127_s0 = inlined_call_operand.vmem [shape: f32[2,16,48], index: 0, kind: input, shape index: {}]   ;;  %s4128_s1 = inlined_call_operand.vmem [shape: bf16[48,32], index: 1, kind: input, shape index: {}]   ;;  %s4129_s2 = inlined_call_operand.vmem [shape: f32[1,32], index: 2, kind: input, shape index: {}]   ;;  %s4130_s3 = inlined_call_operand.vmem [shape: f32[16,32], index: 3, kind: input, shape index: {}]   ;;  %s4131_s4 = inlined_call_operand.vmem [shape: f32[2,1,32], index: 4, kind: input, shape index: {}]   ;;  %s4132_s5 = inlined_call_operand.vmem [shape: f32[2,1,32], index: 5, kind: input, shape index: {}]   ;;  %s4133_s6 = inlined_call_operand.vmem [shape: bf16[2,96,32], index: 6, kind: input, shape index: {}]   ;;  %s4134_s7 = inlined_call_operand.vmem [shape: f32[2,96,1], index: 7, kind: input, shape index: {}]   ;;  %s4135_s8 = inlined_call_operand.vmem [shape: bf16[2,32,32], index: 8, kind: input, shape index: {}]   ;;  %s4136_s9 = inlined_call_operand.vmem [shape: f32[2,1,32], index: 9, kind: input, shape index: {}]   ;;  %s4137_s10 = inlined_call_operand.vmem [shape: f32[2,1,32], index: 10, kind: input, shape index: {}]   ;;  %s4138_s11 = inlined_call_operand.vmem [shape: f32[2,1,32], index: 11, kind: input, shape index: {}]   ;;  %s4139_s12 = inlined_call_operand.vmem [shape: bf16[2,32,128], index: 12, kind: input, shape index: {}]   ;;  %s4140_s13 = inlined_call_operand.vmem [shape: f32[2,1,128], index: 13, kind: input, shape index: {}]   ;;  %s4141_s14 = inlined_call_operand.vmem [shape: bf16[2,128,32], index: 14, kind: input, shape index: {}]   ;;  %s4142_s15 = inlined_call_operand.vmem [shape: f32[2,1,32], index: 15, kind: input, shape index: {}]   ;;  %s4143_s16 = inlined_call_operand.vmem [shape: f32[1,32], index: 16, kind: input, shape index: {}]   ;;  %s4144_s17 = inlined_call_operand.vmem [shape: f32[1,32], index: 17, kind: input, shape index: {}]   ;;  %s4145_s18 = inlined_call_operand.vmem [shape: f32[9,32], index: 18, kind: input, shape index: {}]   ;;  %s4146_s19 = inlined_call_operand.vmem [shape: f32[9,1], index: 19, kind: input, shape index: {}]   ;;  %s4147_s20 = inlined_call_operand.vmem [shape: f32[9,32], index: 20, kind: input, shape index: {}]   ;;  %s4148_s21 = inlined_call_operand.vmem [shape: f32[16,32], index: 21, kind: input, shape index: {}]   ;;  %s4149_s22 = inlined_call_operand.vmem [shape: f32[2,16,128], index: 22, kind: output, shape index: {}]  }
   0x1   :  { %4161 = sst [smem:[#allocation10_spill]] %s4127_s0  ;;  %s3653_s30 = smov 0  }
   0x2   :  { %4162 = sst [smem:[#allocation11_spill]] %s4128_s1 }
   0x3   :  { %4163 = sst [smem:[#allocation12_spill]] %s4129_s2 }
   0x4   :  { %4164 = sst [smem:[#allocation13_spill]] %s4130_s3  ;;  %s3647_s3 = smov 0  }
   0x5   :  { %4165 = sst [smem:[#allocation14_spill]] %s4131_s4  ;;  %s3655_s4 = smov 0  }
   0x6   :  { %4166 = sst [smem:[#allocation15_spill]] %s4132_s5 }
   0x7   :  { %4167 = sst [smem:[#allocation16_spill]] %s4133_s6 }
   0x8   :  { %4168 = sst [smem:[#allocation17_spill]] %s4134_s7 }
   0x9   :  { %4169 = sst [smem:[#allocation18_spill]] %s4143_s16 }
   0xa   :  { %4170 = sst [smem:[#allocation19_spill]] %s4144_s17 }
   0xb   :  { %4171 = sst [smem:[#allocation20_spill]] %s4145_s18 }
   0xc   :  { %4172 = sst [smem:[#allocation21_spill]] %s4146_s19 }
   0xd   :  { %4173 = sst [smem:[#allocation22_spill]] %s4147_s20 }
   0xe   :  { %4174 = sst [smem:[#allocation23_spill]] %s4148_s21 }
   0xf LB: > { %4175 = sst [smem:[#allocation3_spill]] %s3503_s3  ;;  %s41_s0 = sadd.s32 1, %s3511_s29  ;;  %s3519_s4 = sphi %s3655_s4, %s32_s4   ;;  %s3515_s30 = sphi %s3653_s30, %s4211_s30   ;;  %s3511_s29 = sphi %s3651_s29, %s4210_s29   ;;  %s3507_s28 = sphi %s3649_s28, %s4209_s28   ;;  %s3503_s3 = sphi %s3647_s3, %s4208_s3  }
  0x10   : > { %4176 = sst [smem:[#allocation4_spill]] %s3511_s29  ;;  %s44_s23 = sadd.s32 1, %s3515_s30 }
  0x11   : > { %4177 = sst [smem:[#allocation5_spill]] %s3515_s30  ;;  %p42_p0 = scmp.ge.s32.totalorder %s41_s0, 2 }
  0x12   : > { %4178 = sst [smem:[#allocation6_spill]] %s3519_s4  ;;  %p3022_p1 = scmp.ge.s32.totalorder %s3519_s4, 1 }
  0x13   : > { %p730_p2 = scmp.lt.s32.totalorder %s3519_s4, 5  ;;  %s4213_s0 = smov (%p42_p0, %s41_s0), 0 }
  0x14   : > { %4179 = sst [smem:[#allocation7_spill]] %s4213_s0  ;;  %s4215_s23 = smov (!%p42_p0, %s44_s23), %s3515_s30 }
  0x15   : > { %p731_p3 = pnand %p3022_p1, %p730_p2  ;;  %p46_p4 = scmp.ge.s32.totalorder %s4215_s23, 2 }
  0x17   : > { %s4217_s23 = smov (%p46_p4, %s4215_s23), 0  ;;  %734 = sbr.rel (%p731_p3) target bundleno = 4094 (0xffe), region = 108 }
  0x18   : > { %4180 = sst [smem:[#allocation8_spill]] %s4217_s23 }
  0x1e   : > { %p838_p5 = scmp.lt.s32.totalorder %s3507_s28, 1  ;;  %p843_p6 = scmp.lt.s32.totalorder %s3503_s3, 1 }
  0x1f   : > { %s4181_s25 = sld [smem:[#allocation10_spill]]  ;;  %s4186_s7 = sld [smem:[#allocation17_spill]] }
  0x20   : > { %s4219_s28 = smov (!%p838_p5, %s3507_s28), 1 }
  0x21   : > { %s3681_s1 = scalar_select %p843_p6, %s3503_s3, 1 }
  0x22   : > { %s3102_s5 = sshll.u32 %s4219_s28, 4  ;;  %s4185_s28 = sld [smem:[#allocation16_spill]] }
  0x23   : > { %s3325_s21 = smul.u32 48, %s3681_s1  ;;  %s3103_s16 = sshll.u32 %s3681_s1, 4 }
  0x24   : > { %s3326_s17 = smul.u32 96, %s3681_s1  ;;  %s3729_s0 = scalar_lea.vmem %s4139_s12, %s3103_s16 }
  0x25   : > { %s3686_s26 = scalar_lea.vmem %s4181_s25, %s3102_s5  ;;  %s3707_s25 = scalar_lea.vmem %s4135_s8, %s3103_s16 }
  0x26   : > { %4182 = sst [smem:[#allocation9_spill]] %s3686_s26  ;;  %s3712_s23 = scalar_lea.vmem %s4186_s7, %s3326_s17 }
  0x27   : > { %s3105_s7 = sshll.u32 %s3681_s1, 6  ;;  %s888_s4 = scalar_lea.vmem %s4142_s15, %s3681_s1 }
  0x28   : > { %s3702_s3 = scalar_lea.vmem %s4185_s28, %s3325_s21  ;;  %s872_s28 = scalar_lea.vmem %s4138_s11, %s3681_s1 }
  0x29   : > { %s3743_s18 = scalar_lea.vmem %s4141_s14, %s3105_s7  ;;  %s3748_s24 = scalar_lea.vmem %s4149_s22, %s3102_s5 }
  0x2a   : > { %s4187_s16 = sld [smem:[#allocation3_spill]] }
  0x30   : > { %p3035_p7 = scmp.ne.s32.totalorder %s4187_s16, 0 }
  0x31   : > { %s4188_s17 = sld [smem:[#allocation11_spill]] (!%p3035_p7)  ;;  %s4189_s2 = sld [smem:[#allocation9_spill]] (!%p3035_p7)  ;;  %v3521_v1 = vmov (!%p3035_p7), 0.0   ;;  %vm3522_vm0 = vmmov (!%p3035_p7), 0   ;;  %vm928_vm1 = vcmask (!%p3035_p7), 392192   ;;  %vm974_vm2 = vcmask (!%p3035_p7), 253952  }
  0x32   : > { %898 = sbr.rel (%p3035_p7) target bundleno = 284 (0x11c), region = 112  ;;  %3172 = vmatprep.subr.bf16.mxu0 (!%p3035_p7), %v3521_v1  ;;  %3178 = vmatprep.mubr.msk.bf16.mxu0 (!%p3035_p7), %vm3522_vm0, %v3521_v1  ;;  %s4190_s19 = sld [smem:[#allocation12_spill]] (!%p3035_p7)  ;;  %vm976_vm3 = vcmask (!%p3035_p7), 261120  }
  0x33   : > { %s4191_s6 = sld [smem:[#allocation13_spill]] (!%p3035_p7) }
  0x37   : > { %v3378_v0 = vld [vmem:[%s4188_s17] sm:$0xff] (!%p3035_p7)   ;;  %v3379_v2 = vld [vmem:[%s4188_s17 + $0x8] sm:$0xff] (!%p3035_p7)   ;;  %v3380_v3 = vld [vmem:[%s4188_s17 + $0x10] sm:$0xff] (!%p3035_p7)  }
  0x38   : > { %3173 = vmatpush3.bf16.msra.mxu0 (!%p3035_p7), %v3378_v0  ;;  %v899_v4 = vld [vmem:[%s4189_s2] sm:$0xff] (!%p3035_p7)  ;;  %v900_v5 = vld [vmem:[%s4189_s2 + $0x8] sm:$0xff] (!%p3035_p7) }
  0x39   : > { %3174 = vmatprep.subr.bf16.mxu0 %v3521_v1  ;;  %v901_v6 = vpack.c.bf16 %v900_v5, %v899_v4  ;;  %v973_v7 = vld [vmem:[%s4190_s19] sm:$0x1]  ;;  %v909_v10 = vld [vmem:[%s4191_s6 + $0x8] sm:$0xff] }
  0x3a   : > { %975 = vst.msk [vmem:[#allocation2] sm:$0x1] %vm974_vm2, %v973_v7  ;;  %v908_v8 = vld [vmem:[%s4191_s6] sm:$0xff] }
  0x3c   : > { %3175 = vmatpush3.bf16.msra.mxu0 %v3379_v2 }
  0x3d   : > { %3176 = vmatprep.subr.bf16.mxu0 %v3521_v1 }
  0x40   : > { %3177 = vmatpush3.bf16.msra.mxu0 %v3380_v3 }
  0x43   : > { %3179 = vmatmul.mubr.msk.bf16.vlgmr.msra.gmra.mrb[0].mxu0 %vm928_vm1, %v901_v6 }
 0x116   : > { %v966_v9 = vpop.f32.mrb[0].mxu0 }
 0x117   : > { %v967_v11 = vadd.f32 %v966_v9, %v908_v8  ;;  %v3180_v12 = vpop.f32.mrb[1].mxu0 }
 0x118   : > { %v969_v13 = vpop.f32.mrb[2].mxu0 }
 0x119   : > { %977 = vst.msk [vmem:[#allocation2 + $0x1] sm:$0xff] %vm976_vm3, %v967_v11  ;;  %v970_v14 = vadd.f32 %v969_v13, %v909_v10  ;;  %v3181_v15 = vpop.f32.mrb[3].mxu0 }
 0x11b   : > { %978 = vst.msk [vmem:[#allocation2 + $0x9] sm:$0xff] %vm976_vm3, %v970_v14 }
 0x11c PF: > { %vm984_vm4 = vcmask 261120   ;;  %vm991_vm5 = vcmask 253952   ;;  %v3383_v37 = vld [vmem:[%s3702_s3] sm:$0xff]   ;;  %v1059_v38 = vld [vmem:[%s3712_s23 + $0x8] sm:$0xff]  ;;  %v3523_v39 = vmov 0   ;;  %v1060_v41 = vld [vmem:[%s3712_s23 + $0x10] sm:$0xff]  ;;  %s4197_s26 = scalar_lea.vmem %s4137_s10, %s3681_s1 }
 0x11d   : > { %3186 = vmatprep.mubr.msk.bf16.mxu0 %vm984_vm4, %v3383_v37  ;;  %3382 = vset.pattern.permute.xlu1 %v3523_v39  ;;  %v1058_v40 = vld [vmem:[%s3712_s23] sm:$0xff]  ;;  %v1061_v42 = vld [vmem:[%s3712_s23 + $0x18] sm:$0xff]  ;;  %v1063_v44 = vld [vmem:[%s3712_s23 + $0x28] sm:$0xff]  ;;  %s4192_s5 = sld [smem:[#allocation14_spill]]  ;;  %s4194_s19 = sld [smem:[#allocation15_spill]]  ;;  %vm1412_vm6 = vcmask 1043456  }
 0x11e   : > { %3381 = vset.pattern.permute.xlu0 %v3523_v39  ;;  %v1062_v43 = vld [vmem:[%s3712_s23 + $0x20] sm:$0xff]  ;;  %v1064_v45 = vld [vmem:[%s3712_s23 + $0x30] sm:$0xff]  ;;  %v1065_v46 = vld [vmem:[%s3712_s23 + $0x38] sm:$0xff]  ;;  %vm1405_vm7 = vcmask 64512   ;;  %vm1635_vm8 = vcmask 138240   ;;  %vm1642_vm9 = vcmask 131072  }
 0x11f   : > { %v3384_v10 = vld [vmem:[%s3702_s3 + $0x8] sm:$0xff]   ;;  %v3385_v11 = vld [vmem:[%s3702_s3 + $0x10] sm:$0xff]   ;;  %v3386_v12 = vld [vmem:[%s3702_s3 + $0x18] sm:$0xff]   ;;  %vm3525_vm10 = vmmov 0  }
 0x120   : > { %v3771_v16 = vld [vmem:[#allocation2] sm:$0xff] }
 0x121   : > { %v985_v19 = vsel %vm984_vm4, %v3771_v16, 0.0 }
 0x122   : > { %v3773_v17 = vld [vmem:[#allocation2 + $0x10] sm:$0x1]  ;;  %v3775_v18 = vld [vmem:[#allocation2 + $0x8] sm:$0xff]  ;;  %986 = vadd.xlane.f32.xlu0 %v985_v19 }
 0x123   : > { %v992_v20 = vsel %vm991_vm5, %v3773_v17, 0.0  ;;  %v988_v21 = vsel %vm984_vm4, %v3775_v18, 0.0  ;;  %s4193_s30 = scalar_lea.vmem %s4192_s5, %s3681_s1  ;;  %s4195_s21 = scalar_lea.vmem %s4194_s19, %s3681_s1 }
 0x124   : > { %993 = vadd.xlane.f32.xlu1 %v992_v20  ;;  %v3040_v58 = vld [vmem:[%s4193_s30] ss:$0 sm:$0xff]  ;;  %s4198_s5 = scalar_lea.vmem %s4140_s13, %s3681_s1 }
 0x125   : > { %v3041_v0 = vld [vmem:[%s4195_s21] ss:$0 sm:$0xff] }
 0x126   : > { %989 = vadd.xlane.f32.xlu0 %v988_v21 }
 0x1af   : > { %v987_v22 = vpop.xlane.xlu0 %986 }
 0x1b0   : > { %v996_v24 = vmul.f32 0.03125, %v987_v22 }
 0x1b1   : > { %v994_v23 = vpop.xlane.xlu1 %993 }
 0x1b2   : > { %v998_v25 = vmul.f32 0.03125, %v994_v23  ;;  %v999_v26 = vsub.f32 %v3771_v16, %v996_v24 }
 0x1b3   : > { %v990_v28 = vpop.xlane.xlu0 %989 }
 0x1b4   : > { %v1001_v27 = vsub.f32 %v3773_v17, %v998_v25  ;;  %v997_v29 = vmul.f32 0.03125, %v990_v28  ;;  %v1002_v30 = vmul.f32 %v999_v26, %v999_v26 }
 0x1b6   : > { %v1004_v31 = vmul.f32 %v1001_v27, %v1001_v27  ;;  %v1000_v32 = vsub.f32 %v3775_v18, %v997_v29  ;;  %v1005_v33 = vsel %vm984_vm4, %v1002_v30, 0.0 }
 0x1b7   : > { %1006 = vadd.xlane.f32.xlu1 %v1005_v33 }
 0x1b8   : > { %v1011_v34 = vsel %vm991_vm5, %v1004_v31, 0.0  ;;  %v1003_v35 = vmul.f32 %v1000_v32, %v1000_v32 }
 0x1ba   : > { %v1008_v36 = vsel %vm984_vm4, %v1003_v35, 0.0 }
 0x1bb   : > { %1012 = vadd.xlane.f32.xlu1 %v1011_v34  ;;  %1009 = vadd.xlane.f32.xlu0 %v1008_v36 }
 0x1cc   : > { %1077 = vperm.xlu1 %3382, %v1059_v38  }
 0x1d0   : > { %1082 = vperm.xlu1 %3382, %v1060_v41  }
 0x1d1   : > { %1072 = vperm.xlu0 %3381, %v1058_v40  }
 0x1d4   : > { %1087 = vperm.xlu1 %3382, %v1061_v42  }
 0x1d8   : > { %1092 = vperm.xlu1 %3382, %v1062_v43  }
 0x1dc   : > { %1097 = vperm.xlu1 %3382, %v1063_v44  }
 0x1e0   : > { %1102 = vperm.xlu1 %3382, %v1064_v45  }
 0x1e4   : > { %1107 = vperm.xlu1 %3382, %v1065_v46  }
 0x244   : > { %v1007_v47 = vpop.xlane.xlu1 %1006 }
 0x245   : > { %v1014_v48 = vmul.f32 0.03125, %v1007_v47 }
 0x247   : > { %v1017_v49 = vadd.f32 1e-06, %v1014_v48 }
 0x248   : > { %v1013_v50 = vpop.xlane.xlu1 %1012  ;;  %v1010_v51 = vpop.xlane.xlu0 %1009 }
 0x249   : > { %3401 = vrsqrt.f32 %v1017_v49  ;;  %v1016_v52 = vmul.f32 0.03125, %v1013_v50  ;;  %v1015_v53 = vmul.f32 0.03125, %v1010_v51 }
 0x24b   : > { %v1019_v54 = vadd.f32 1e-06, %v1016_v52  ;;  %v1018_v55 = vadd.f32 1e-06, %v1015_v53 }
 0x24c   : > { %v1078_v13 = vpop.permute.xlu1 %1077 }
 0x24d   : > { %3403 = vrsqrt.f32 %v1019_v54 }
 0x24e   : > { %3405 = vrsqrt.f32 %v1018_v55 }
 0x250   : > { %v1083_v14 = vpop.permute.xlu1 %1082  ;;  %v1073_v19 = vpop.permute.xlu0 %1072 }
 0x253   : > { %v3402_v56 = vpop.eup %3401 }
 0x254   : > { %v1023_v57 = vmul.f32 %v3402_v56, %v999_v26  ;;  %v1088_v15 = vpop.permute.xlu1 %1087 }
 0x256   : > { %v1032_v63 = vmul.f32 %v3040_v58, %v1023_v57 }
 0x257   : > { %v3404_v59 = vpop.eup %3403 }
 0x258   : > { %v3406_v60 = vpop.eup %3405  ;;  %v1025_v61 = vmul.f32 %v3404_v59, %v1001_v27  ;;  %v1041_v3 = vadd.f32 %v3041_v0, %v1032_v63  ;;  %v1093_v26 = vpop.permute.xlu1 %1092 }
 0x259   : > { %v1024_v62 = vmul.f32 %v3406_v60, %v1000_v32 }
 0x25a   : > { %v1034_v1 = vmul.f32 %v3040_v58, %v1025_v61 }
 0x25b   : > { %v1033_v2 = vmul.f32 %v3040_v58, %v1024_v62 }
 0x25c   : > { %v1043_v5 = vadd.f32 %v3041_v0, %v1034_v1  ;;  %v1098_v32 = vpop.permute.xlu1 %1097 }
 0x25d   : > { %v1042_v4 = vadd.f32 %v3041_v0, %v1033_v2 }
 0x25e   : > { %v1057_v8 = vpack.c.bf16 %v1043_v5, %v1043_v5  ;;  %v3388_v5 = vld [vmem:[%s3702_s3 + $0x28] sm:$0xff]  }
 0x25f   : > { %v1056_v6 = vpack.c.bf16 %v1042_v4, %v1041_v3  ;;  %v3387_v4 = vld [vmem:[%s3702_s3 + $0x20] sm:$0xff]  }
 0x260   : > { %v1182_v9 = vsel %vm984_vm4, %v1057_v8, 0  ;;  %v1103_v39 = vpop.permute.xlu1 %1102 }
 0x261   : > { %3319 = vmatprep.subr.msk.bf16.mxu0 %vm984_vm4, %v1056_v6  ;;  %v1179_v7 = vsel %vm984_vm4, %v1056_v6, 0 }
 0x262   : > { %3183 = vmatpush3.bf16.xpose.msra.mxu0 %v1179_v7 }
 0x263   : > { %3320 = vmatprep.subr.msk.bf16.mxu0 %vm984_vm4, %v1057_v8 }
 0x264   : > { %v1108_v40 = vpop.permute.xlu1 %1107 }
 0x26a   : > { %3185 = vmatpush3.bf16.xpose.msra.mxu0 %v1182_v9 }
 0x271   : > { %3187 = vmatmul.mubr.msk.bf16.vlgmr.msra.gmra.mrb[0].mxu0 %vm984_vm4, %v3384_v10 }
 0x272   : > { %3190 = vmatprep.mubr.msk.bf16.mxu0 %vm984_vm4, %v3385_v11 }
 0x279   : > { %3191 = vmatmul.mubr.msk.bf16.gmra.mrb[4].mxu0 %vm984_vm4, %v3386_v12 }
 0x27a   : > { %3194 = vmatprep.mubr.msk.bf16.mxu0 %vm984_vm4, %v3387_v4 }
 0x281   : > { %3195 = vmatmul.mubr.msk.bf16.gmra.mrb[8].mxu0 %vm984_vm4, %v3388_v5 }
 0x344   : > { %v3188_v20 = vpop.f32.mrb[0].mxu0 }
 0x345   : > { %v1218_v21 = vpop.f32.mrb[1].mxu0  ;;  %v1227_v36 = vadd.f32 %v3188_v20, %v1083_v14 }
 0x346   : > { %v1219_v22 = vadd.f32 %v1218_v21, %v1073_v19  ;;  %v3189_v23 = vpop.f32.mrb[2].mxu0 }
 0x347   : > { %v1221_v24 = vpop.f32.mrb[3].mxu0  ;;  %v1230_v31 = vadd.f32 %v3189_v23, %v1088_v15 }
 0x348   : > { %v1222_v25 = vadd.f32 %v1221_v24, %v1078_v13  ;;  %1265 = vxpose.xlu1.b32.start.end [1/1] (short) (narrow) %v1219_v22, 24 }
 0x34a   : > { %1297 = vxpose.xlu0.b32.start.end [1/1] (short) (narrow) %v1222_v25, 24 }
 0x34c   : > { %v3192_v27 = vpop.f32.mrb[4].mxu0 }
 0x34d   : > { %v1234_v28 = vpop.f32.mrb[5].mxu0  ;;  %v1243_v46 = vadd.f32 %v3192_v27, %v1103_v39 }
 0x34e   : > { %v1235_v29 = vadd.f32 %v1234_v28, %v1093_v26  ;;  %v3193_v30 = vpop.f32.mrb[6].mxu0 }
 0x34f   : > { %v1237_v33 = vpop.f32.mrb[7].mxu0  ;;  %v1403_v51 = vpack.c.bf16 %v1243_v46, %v1243_v46  ;;  %v1246_v54 = vadd.f32 %v3193_v30, %v1108_v40 }
 0x350   : > { %v1401_v34 = vpack.c.bf16 %v1235_v29, %v1235_v29  ;;  %v1238_v35 = vadd.f32 %v1237_v33, %v1098_v32 }
 0x351   : > { %1361 = vxpose.xlu1.b32.start.end [1/1] (short) (narrow) %v1230_v31, 24  ;;  %v1528_v58 = vsel %vm1412_vm6, %v1403_v51, 0  ;;  %v1404_v59 = vpack.c.bf16 %v1246_v54, %v1246_v54 }
 0x352   : > { %v1402_v37 = vpack.c.bf16 %v1238_v35, %v1238_v35  ;;  %3321 = vmatprep.subr.msk.bf16.mxu1 %vm1412_vm6, %v1401_v34  ;;  %v1414_v38 = vsel %vm1412_vm6, %v1401_v34, 0 }
 0x353   : > { %3199 = vmatpush3.bf16.msra.mxu1 %v1414_v38  ;;  %1329 = vxpose.xlu0.b32.start.end [1/1] (short) (narrow) %v1227_v36, 24  ;;  %v1585_v1 = vsel %vm1412_vm6, %v1404_v59, 0 }
 0x354   : > { %3322 = vmatprep.subr.msk.bf16.mxu1 %vm1412_vm6, %v1402_v37  ;;  %v1471_v52 = vsel %vm1412_vm6, %v1402_v37, 0 }
 0x3c8   : > { %v1281_v41 = vpop.trf.xlu1 }
 0x3ca   : > { %v1313_v42 = vpop.trf.xlu0 }
 0x3cc   : > { %v1282_v43 = vpop.trf.xlu1 }
 0x3cd   : > { %v1393_v44 = vpack.c.bf16 %v1282_v43, %v1281_v41 }
 0x3ce   : > { %v1314_v45 = vpop.trf.xlu0 }
 0x3cf   : > { %3200 = vmatprep.mubr.msk.bf16.mxu1 %vm1405_vm7, %v1393_v44  ;;  %v1395_v48 = vpack.c.bf16 %v1314_v45, %v1313_v42 }
 0x3d0   : > { %v1283_v47 = vpop.trf.xlu1 }
 0x3d1   : > { %v1394_v49 = vpack.c.bf16 %v1283_v47, %v1283_v47 }
 0x3d2   : > { %v1315_v50 = vpop.trf.xlu0 }
 0x3d3   : > { %3201 = vmatmul.mubr.msk.bf16.vlgmr.msra.gmra.mrb[0].mxu1 %vm1405_vm7, %v1394_v49  ;;  %v1396_v55 = vpack.c.bf16 %v1315_v50, %v1315_v50 }
 0x3d4   : > { %3205 = vmatpush3.bf16.msra.mxu1 %v1471_v52  ;;  %3206 = vmatprep.mubr.msk.bf16.mxu1 %vm1405_vm7, %v1395_v48  ;;  %v1377_v56 = vpop.trf.xlu1 }
 0x3d5   : > { %3323 = vmatprep.subr.msk.bf16.mxu1 %vm1412_vm6, %v1403_v51 }
 0x3d6   : > { %v1345_v53 = vpop.trf.xlu0 }
 0x3d8   : > { %v1378_v62 = vpop.trf.xlu1 }
 0x3d9   : > { %v1399_v0 = vpack.c.bf16 %v1378_v62, %v1377_v56 }
 0x3da   : > { %v1346_v57 = vpop.trf.xlu0 }
 0x3db   : > { %3207 = vmatmul.mubr.msk.bf16.vlgmr.msra.gmra.mrb[4].mxu1 %vm1405_vm7, %v1396_v55  ;;  %v1397_v60 = vpack.c.bf16 %v1346_v57, %v1345_v53 }
 0x3dc   : > { %3211 = vmatpush3.bf16.msra.mxu1 %v1528_v58  ;;  %v1379_v2 = vpop.trf.xlu1 }
 0x3dd   : > { %3324 = vmatprep.subr.msk.bf16.mxu1 %vm1412_vm6, %v1404_v59  ;;  %3212 = vmatprep.mubr.msk.bf16.mxu1 %vm1405_vm7, %v1397_v60  ;;  %v1400_v3 = vpack.c.bf16 %v1379_v2, %v1379_v2 }
 0x3de   : > { %v1347_v61 = vpop.trf.xlu0 }
 0x3df   : > { %v1398_v63 = vpack.c.bf16 %v1347_v61, %v1347_v61 }
 0x3e3   : > { %3213 = vmatmul.mubr.msk.bf16.vlgmr.msra.gmra.mrb[8].mxu1 %vm1405_vm7, %v1398_v63 }
 0x3e4   : > { %3217 = vmatpush3.bf16.msra.mxu1 %v1585_v1  ;;  %3218 = vmatprep.mubr.msk.bf16.mxu1 %vm1405_vm7, %v1399_v0 }
 0x3eb   : > { %3219 = vmatmul.mubr.msk.bf16.vlgmr.msra.gmra.mrb[12].mxu1 %vm1405_vm7, %v1400_v3 }
 0x4a6   : > { %v3202_v6 = vpop.f32.mrb[0].mxu1 }
 0x4a7   : > { %v1450_v7 = vpop.f32.mrb[1].mxu1  ;;  %v1643_v12 = vsel %vm1642_vm9, %v3202_v6, -inf }
 0x4a8   : > { %v3203_v8 = vpop.f32.mrb[2].mxu1  ;;  %v1636_v9 = vsel %vm1635_vm8, %v1450_v7, -inf }
 0x4a9   : > { %1637 = vmax.xlane.f32.xlu0 %v1636_v9  ;;  %v1453_v10 = vpop.f32.mrb[3].mxu1 }
 0x4aa   : > { %v1639_v11 = vsel %vm1635_vm8, %v1453_v10, -inf }
 0x4ab   : > { %1640 = vmax.xlane.f32.xlu1 %v1639_v11 }
 0x4ad   : > { %1644 = vmax.xlane.f32.xlu0 %v1643_v12 }
 0x4ae   : > { %v3208_v13 = vpop.f32.mrb[4].mxu1 }
 0x4af   : > { %v1507_v14 = vpop.f32.mrb[5].mxu1  ;;  %v1652_v22 = vsel %vm1642_vm9, %v3208_v13, -inf }
 0x4b0   : > { %v3209_v15 = vpop.f32.mrb[6].mxu1  ;;  %v1646_v19 = vsel %vm1635_vm8, %v1507_v14, -inf }
 0x4b1   : > { %1647 = vmax.xlane.f32.xlu1 %v1646_v19  ;;  %v1510_v20 = vpop.f32.mrb[7].mxu1 }
 0x4b2   : > { %v1649_v21 = vsel %vm1635_vm8, %v1510_v20, -inf }
 0x4b3   : > { %1650 = vmax.xlane.f32.xlu0 %v1649_v21 }
 0x4b5   : > { %1653 = vmax.xlane.f32.xlu1 %v1652_v22 }
 0x4b6   : > { %v3845_v23 = vpop.f32.mrb[8].mxu1 }
 0x4b7   : > { %v3847_v24 = vpop.f32.mrb[9].mxu1  ;;  %v1661_v35 = vsel %vm1642_vm9, %v3845_v23, -inf }
 0x4b8   : > { %v3215_v25 = vpop.f32.mrb[10].mxu1  ;;  %v1655_v26 = vsel %vm1635_vm8, %v3847_v24, -inf }
 0x4b9   : > { %1656 = vmax.xlane.f32.xlu0 %v1655_v26  ;;  %v3851_v27 = vpop.f32.mrb[11].mxu1  ;;  %v1066_v26 = vld [vmem:[%s3712_s23 + $0x40] sm:$0xff] }
 0x4ba   : > { %v1658_v28 = vsel %vm1635_vm8, %v3851_v27, -inf }
 0x4bb   : > { %1659 = vmax.xlane.f32.xlu1 %v1658_v28 }
 0x4be   : > { %v3855_v29 = vpop.f32.mrb[12].mxu1 }
 0x4bf   : > { %v3857_v30 = vpop.f32.mrb[13].mxu1  ;;  %v1670_v36 = vsel %vm1642_vm9, %v3855_v29, -inf }
 0x4c0   : > { %v3221_v31 = vpop.f32.mrb[14].mxu1  ;;  %v1664_v32 = vsel %vm1635_vm8, %v3857_v30, -inf }
 0x4c1   : > { %1665 = vmax.xlane.f32.xlu0 %v1664_v32  ;;  %v3861_v33 = vpop.f32.mrb[15].mxu1  ;;  %v3524_v32 = vmov 0.0  }
 0x4c2   : > { %v1667_v34 = vsel %vm1635_vm8, %v3861_v33, -inf  ;;  %3222 = vmatprep.subr.bf16.mxu1 %v3524_v32  ;;  %3238 = vmatprep.subr.bf16.mxu0 %v3524_v32 }
 0x4c3   : > { %1668 = vmax.xlane.f32.xlu1 %v1667_v34  ;;  %3226 = vmatprep.mubr.msk.bf16.mxu1 %vm3525_vm10, %v3524_v32 }
 0x4c4   : > { %3242 = vmatprep.mubr.msk.bf16.mxu0 %vm3525_vm10, %v3524_v32 }
 0x4c5   : > { %1662 = vmax.xlane.f32.xlu0 %v1661_v35 }
 0x4c7   : > { %1671 = vmax.xlane.f32.xlu1 %v1670_v36 }
 0x536   : > { %v1638_v37 = vpop.xlane.xlu0 %1637 }
 0x537   : > { %v1673_v39 = vsub.f32 %v1450_v7, %v1638_v37 }
 0x538   : > { %v1641_v38 = vpop.xlane.xlu1 %1640 }
 0x539   : > { %v1674_v40 = vsub.f32 %v1453_v10, %v1641_v38  ;;  %v1685_v44 = vmul.f32 1.442695, %v1673_v39  ;;  %v1067_v38 = vld [vmem:[%s3712_s23 + $0x48] sm:$0xff] }
 0x53a   : > { %v1645_v41 = vpop.xlane.xlu0 %1644 }
 0x53b   : > { %v1687_v42 = vmul.f32 1.442695, %v1674_v40  ;;  %v1675_v43 = vsub.f32 %v3202_v6, %v1645_v41 }
 0x53d   : > { %3407 = vpow2.f32 %v1687_v42  ;;  %v1689_v45 = vmul.f32 1.442695, %v1675_v43  ;;  %v1068_v43 = vld [vmem:[%s3712_s23 + $0x50] sm:$0xff] }
 0x53e   : > { %v1648_v46 = vpop.xlane.xlu1 %1647 }
 0x53f   : > { %3409 = vpow2.f32 %v1689_v45  ;;  %v1676_v48 = vsub.f32 %v1507_v14, %v1648_v46 }
 0x540   : > { %v1651_v47 = vpop.xlane.xlu0 %1650  ;;  %3411 = vpow2.f32 %v1685_v44  ;;  %v1069_v44 = vld [vmem:[%s3712_s23 + $0x58] sm:$0xff]  ;;  %s4196_s23 = scalar_lea.vmem %s4136_s9, %s3681_s1  ;;  %s4199_s1 = sld [smem:[#allocation3_spill]] }
 0x541   : > { %v1677_v49 = vsub.f32 %v1510_v20, %v1651_v47  ;;  %v1691_v53 = vmul.f32 1.442695, %v1676_v48 }
 0x542   : > { %v1654_v50 = vpop.xlane.xlu1 %1653 }
 0x543   : > { %v1693_v51 = vmul.f32 1.442695, %v1677_v49  ;;  %v1678_v52 = vsub.f32 %v3208_v13, %v1654_v50 }
 0x545   : > { %3413 = vpow2.f32 %v1693_v51  ;;  %v1695_v54 = vmul.f32 1.442695, %v1678_v52 }
 0x546   : > { %v1657_v58 = vpop.xlane.xlu0 %1656  ;;  %p3087_p8 = scmp.ne.s32.totalorder %s4199_s1, 1 }
 0x547   : > { %v3869_v55 = vpop.eup %3407  ;;  %3415 = vpow2.f32 %v1695_v54  ;;  %v1679_v34 = vsub.f32 %v3847_v24, %v1657_v58  ;;  %s4200_s27 = sld [smem:[#allocation20_spill]] (!%p3087_p8)  ;;  %s4201_s3 = sld [smem:[#allocation21_spill]] (!%p3087_p8)  ;;  %vm2451_vm11 = vcmask (!%p3087_p8), 1046528   ;;  %vm3310_vm12 = vmpackc.low (!%p3087_p8), %vm984_vm4, %vm984_vm4  ;;  %vm2560_vm13 = vcmask (!%p3087_p8), 122880  }
 0x548   : > { %v1712_v56 = vsel %vm1635_vm8, %v3869_v55, 0.0  ;;  %3417 = vpow2.f32 %v1691_v53  ;;  %v1660_v61 = vpop.xlane.xlu1 %1659  ;;  %s4203_s29 = sld [smem:[#allocation18_spill]] (!%p3087_p8)  ;;  %s4204_s7 = sld [smem:[#allocation19_spill]] (!%p3087_p8)  ;;  %vm2558_vm14 = vcmask (!%p3087_p8), 130048   ;;  %vm2782_vm0 = vcmask (!%p3087_p8), 261248  }
 0x549   : > { %v3873_v57 = vpop.eup %3409  ;;  %1713 = vadd.xlane.f32.xlu1 %v1712_v56  ;;  %v1680_v3 = vsub.f32 %v3851_v27, %v1660_v61  ;;  %v1697_v35 = vmul.f32 1.442695, %v1679_v34  ;;  %s3528_s30 = smov (!%p3087_p8), 16   ;;  %s3529_s1 = smov (!%p3087_p8), 32   ;;  %vm2784_vm1 = vcmask (!%p3087_p8), 254080   ;;  %vm2790_vm2 = vcmask (!%p3087_p8), 385280  }
 0x54a   : > { %v1715_v59 = vsel %vm1642_vm9, %v3873_v57, 0.0  ;;  %v3877_v60 = vpop.eup %3411  ;;  %s4205_s19 = sld [smem:[#allocation23_spill]] (!%p3087_p8)  ;;  %vm2816_vm3 = vcmask (!%p3087_p8), 647552   ;;  %vm2826_vm6 = vcmask (!%p3087_p8), 720512  }
 0x54b   : > { %1716 = vadd.xlane.f32.xlu0 %v1715_v59  ;;  %v1709_v63 = vsel %vm1635_vm8, %v3877_v60, 0.0  ;;  %v1699_v10 = vmul.f32 1.442695, %v1680_v3 }
 0x54e   : > { %v1666_v62 = vpop.xlane.xlu0 %1665 }
 0x54f   : > { %v3881_v0 = vpop.eup %3413  ;;  %1710 = vadd.xlane.f32.xlu0 %v1709_v63  ;;  %v1682_v36 = vsub.f32 %v3857_v30, %v1666_v62 }
 0x550   : > { %v1669_v1 = vpop.xlane.xlu1 %1668  ;;  %v1721_v6 = vsel %vm1635_vm8, %v3881_v0, 0.0 }
 0x551   : > { %v3883_v2 = vpop.eup %3415  ;;  %v1683_v14 = vsub.f32 %v3861_v33, %v1669_v1  ;;  %v1703_v37 = vmul.f32 1.442695, %v1682_v36 }
 0x552   : > { %v1663_v4 = vpop.xlane.xlu0 %1662  ;;  %v1724_v5 = vsel %vm1642_vm9, %v3883_v2, 0.0  ;;  %v3890_v7 = vpop.eup %3417 }
 0x553   : > { %v1681_v8 = vsub.f32 %v3845_v23, %v1663_v4  ;;  %1725 = vadd.xlane.f32.xlu1 %v1724_v5  ;;  %1722 = vadd.xlane.f32.xlu0 %v1721_v6  ;;  %v1718_v13 = vsel %vm1635_vm8, %v3890_v7, 0.0  ;;  %v1705_v19 = vmul.f32 1.442695, %v1683_v14  ;;  %v3903_v23 = vpop.f32.mrb[8].mxu0 }
 0x554   : > { %v1672_v9 = vpop.xlane.xlu1 %1671  ;;  %v3908_v27 = vpop.f32.mrb[9].mxu0 }
 0x555   : > { %v1701_v11 = vmul.f32 1.442695, %v1681_v8  ;;  %v1684_v12 = vsub.f32 %v3855_v29, %v1672_v9  ;;  %v3927_v39 = vpop.f32.mrb[10].mxu0 }
 0x556   : > { %v1253_v40 = vpop.f32.mrb[11].mxu0 }
 0x557   : > { %3419 = vpow2.f32 %v1701_v11  ;;  %1719 = vadd.xlane.f32.xlu1 %v1718_v13  ;;  %v1707_v15 = vmul.f32 1.442695, %v1684_v12 }
 0x558   : > { %3421 = vpow2.f32 %v1699_v10 }
 0x559   : > { %3423 = vpow2.f32 %v1707_v15 }
 0x55a   : > { %3425 = vpow2.f32 %v1705_v19 }
 0x55b   : > { %3427 = vpow2.f32 %v1697_v35 }
 0x55c   : > { %3429 = vpow2.f32 %v1703_v37 }
 0x561   : > { %v3897_v20 = vpop.eup %3419 }
 0x562   : > { %v1733_v21 = vsel %vm1642_vm9, %v3897_v20, 0.0  ;;  %v3901_v22 = vpop.eup %3421 }
 0x563   : > { %1734 = vadd.xlane.f32.xlu1 %v1733_v21  ;;  %v1730_v25 = vsel %vm1635_vm8, %v3901_v22, 0.0  ;;  %v3910_v28 = vpop.eup %3423 }
 0x564   : > { %v1742_v29 = vsel %vm1642_vm9, %v3910_v28, 0.0  ;;  %v3914_v31 = vpop.eup %3425 }
 0x565   : > { %v1739_v33 = vsel %vm1635_vm8, %v3914_v31, 0.0  ;;  %v3929_v24 = vpop.eup %3427 }
 0x566   : > { %v1727_v30 = vsel %vm1635_vm8, %v3929_v24, 0.0  ;;  %v3933_v41 = vpop.eup %3429 }
 0x567   : > { %1731 = vadd.xlane.f32.xlu1 %v1730_v25  ;;  %v1736_v42 = vsel %vm1635_vm8, %v3933_v41, 0.0 }
 0x569   : > { %1112 = vperm.xlu0 %3381, %v1066_v26  }
 0x56b   : > { %1743 = vadd.xlane.f32.xlu1 %v1742_v29 }
 0x56f   : > { %1740 = vadd.xlane.f32.xlu1 %v1739_v33 }
 0x580   : > { %1117 = vperm.xlu1 %3382, %v1067_v38  }
 0x588   : > { %1728 = vadd.xlane.f32.xlu0 %v1727_v30 }
 0x58c   : > { %1737 = vadd.xlane.f32.xlu0 %v1736_v42 }
 0x5a2   : > { %1122 = vperm.xlu0 %3381, %v1068_v43  }
 0x5a6   : > { %1127 = vperm.xlu0 %3381, %v1069_v44  }
 0x5d6   : > { %v1714_v45 = vpop.xlane.xlu1 %1713 }
 0x5d7   : > { %3431 = vrcp.f32 %v1714_v45 }
 0x5d8   : > { %v1717_v46 = vpop.xlane.xlu0 %1716 }
 0x5dc   : > { %v1711_v47 = vpop.xlane.xlu0 %1710 }
 0x5dd   : > { %3433 = vrcp.f32 %v1711_v47 }
 0x5de   : > { %3435 = vrcp.f32 %v1717_v46 }
 0x5e0   : > { %v1726_v48 = vpop.xlane.xlu1 %1725  ;;  %v1723_v51 = vpop.xlane.xlu0 %1722 }
 0x5e1   : > { %v3432_v50 = vpop.eup %3431 }
 0x5e2   : > { %v1758_v54 = vmul.f32 %v3432_v50, %v3869_v55 }
 0x5e4   : > { %v1720_v49 = vpop.xlane.xlu1 %1719 }
 0x5e5   : > { %3437 = vrcp.f32 %v1720_v49 }
 0x5e6   : > { %3439 = vrcp.f32 %v1723_v51 }
 0x5e7   : > { %v3434_v52 = vpop.eup %3433  ;;  %3441 = vrcp.f32 %v1726_v48 }
 0x5e8   : > { %v1757_v53 = vmul.f32 %v3434_v52, %v3877_v60  ;;  %v3436_v56 = vpop.eup %3435  ;;  %v1113_v4 = vpop.permute.xlu0 %1112 }
 0x5e9   : > { %v1759_v61 = vmul.f32 %v3436_v56, %v3873_v57  ;;  %v1251_v6 = vadd.f32 %v3908_v27, %v1113_v4 }
 0x5ea   : > { %v1773_v58 = vpack.c.bf16 %v1758_v54, %v1757_v53 }
 0x5eb   : > { %v1774_v63 = vpack.c.bf16 %v1759_v61, %v1759_v61  ;;  %v1769_v11 = vpack.c.bf16 %v1251_v6, %v1251_v6 }
 0x5ec   : > { %v1785_v59 = vsel %vm1635_vm8, %v1773_v58, 0 }
 0x5ed   : > { %3223 = vmatpush3.bf16.xpose.msra.mxu1 %v1785_v59  ;;  %v1788_v60 = vsel %vm1635_vm8, %v1774_v63, 0  ;;  %v3389_v59 = vld [vmem:[%s3707_s25] sm:$0xff]  }
 0x5ee   : > { %3224 = vmatprep.subr.bf16.mxu1 %v3524_v32 }
 0x5ef   : > { %v3438_v1 = vpop.eup %3437 }
 0x5f0   : > { %v1735_v62 = vpop.xlane.xlu1 %1734  ;;  %v3440_v3 = vpop.eup %3439  ;;  %v1760_v55 = vmul.f32 %v3438_v1, %v3890_v7 }
 0x5f1   : > { %v1761_v57 = vmul.f32 %v3440_v3, %v3881_v0  ;;  %v3442_v10 = vpop.eup %3441 }
 0x5f2   : > { %v1762_v13 = vmul.f32 %v3442_v10, %v3883_v2  ;;  %v3066_v10 = vld [vmem:[%s4196_s23] ss:$0 sm:$0xff]  ;;  %s4206_s23 = sld [smem:[#allocation22_spill]] (!%p3087_p8) }
 0x5f3   : > { %v1775_v9 = vpack.c.bf16 %v1761_v57, %v1760_v55 }
 0x5f4   : > { %v1732_v5 = vpop.xlane.xlu1 %1731  ;;  %v1776_v7 = vpack.c.bf16 %v1762_v13, %v1762_v13 }
 0x5f5   : > { %3225 = vmatpush3.bf16.xpose.msra.mxu1 %v1788_v60  ;;  %v1834_v12 = vsel %vm1635_vm8, %v1775_v9, 0  ;;  %3443 = vrcp.f32 %v1732_v5 }
 0x5f6   : > { %3230 = vmatprep.subr.bf16.mxu1 %v3524_v32  ;;  %v1837_v0 = vsel %vm1635_vm8, %v1776_v7, 0 }
 0x5f8   : > { %v1744_v8 = vpop.xlane.xlu1 %1743 }
 0x5fc   : > { %3227 = vmatmul.mubr.msk.bf16.vlgmr.msra.gmra.mrb[16].mxu1 %vm1635_vm8, %v1769_v11  ;;  %v1741_v14 = vpop.xlane.xlu1 %1740 }
 0x5fd   : > { %3231 = vmatpush3.bf16.xpose.msra.mxu1 %v1834_v12  ;;  %3234 = vmatprep.mubr.msk.bf16.mxu1 %vm3525_vm10, %v3524_v32 }
 0x5fe   : > { %3232 = vmatprep.subr.bf16.mxu1 %v3524_v32 }
 0x5ff   : > { %v3444_v26 = vpop.eup %3443 }
 0x600   : > { %v1118_v15 = vpop.permute.xlu1 %1117  ;;  %v1764_v34 = vmul.f32 %v3444_v26, %v3901_v22 }
 0x601   : > { %v1254_v19 = vadd.f32 %v1253_v40, %v1118_v15 }
 0x603   : > { %v1770_v21 = vpack.c.bf16 %v1254_v19, %v1254_v19 }
 0x605   : > { %3233 = vmatpush3.bf16.xpose.msra.mxu1 %v1837_v0 }
 0x606   : > { %3246 = vmatprep.subr.bf16.mxu1 %v3524_v32 }
 0x60c   : > { %3235 = vmatmul.mubr.msk.bf16.vlgmr.msra.gmra.mrb[20].mxu1 %vm1635_vm8, %v1770_v21 }
 0x60d   : > { %3250 = vmatprep.mubr.msk.bf16.mxu1 %vm3525_vm10, %v3524_v32 }
 0x615   : > { %v1729_v2 = vpop.xlane.xlu0 %1728 }
 0x616   : > { %3445 = vrcp.f32 %v1729_v2 }
 0x617   : > { %3447 = vrcp.f32 %v1735_v62 }
 0x618   : > { %3449 = vrcp.f32 %v1741_v14 }
 0x619   : > { %v1738_v25 = vpop.xlane.xlu0 %1737 }
 0x61a   : > { %3451 = vrcp.f32 %v1738_v25 }
 0x61b   : > { %3453 = vrcp.f32 %v1744_v8 }
 0x620   : > { %v3446_v27 = vpop.eup %3445 }
 0x621   : > { %v3448_v29 = vpop.eup %3447  ;;  %v1763_v33 = vmul.f32 %v3446_v27, %v3929_v24  ;;  %v1123_v46 = vpop.permute.xlu0 %1122 }
 0x622   : > { %v3450_v35 = vpop.eup %3449  ;;  %v1765_v42 = vmul.f32 %v3448_v29, %v3897_v20  ;;  %v1259_v20 = vadd.f32 %v3903_v23, %v1123_v46 }
 0x623   : > { %v1777_v36 = vpack.c.bf16 %v1764_v34, %v1763_v33  ;;  %v1767_v30 = vmul.f32 %v3450_v35, %v3914_v31 }
 0x624   : > { %v3452_v37 = vpop.eup %3451  ;;  %v1778_v45 = vpack.c.bf16 %v1765_v42, %v1765_v42  ;;  %v1771_v49 = vpack.c.bf16 %v1259_v20, %v1259_v20 }
 0x625   : > { %v1883_v38 = vsel %vm1635_vm8, %v1777_v36, 0  ;;  %v1766_v40 = vmul.f32 %v3452_v37, %v3933_v41  ;;  %v3454_v43 = vpop.eup %3453  ;;  %v1128_v31 = vpop.permute.xlu0 %1127 }
 0x626   : > { %3239 = vmatpush3.bf16.xpose.msra.mxu0 %v1883_v38  ;;  %v1768_v22 = vmul.f32 %v3454_v43, %v3910_v28  ;;  %v1886_v41 = vsel %vm1635_vm8, %v1778_v45, 0  ;;  %v1262_v50 = vadd.f32 %v3927_v39, %v1128_v31  ;;  %v3390_v39 = vld [vmem:[%s3707_s25 + $0x8] sm:$0xff]   ;;  %s4202_s25 = smov (!%p3087_p8), %s4201_s3 }
 0x627   : > { %v1779_v44 = vpack.c.bf16 %v1767_v30, %v1766_v40  ;;  %3240 = vmatprep.subr.bf16.mxu0 %v3524_v32  ;;  %v3392_v45 = vld [vmem:[%s3729_s0 + $0x8] sm:$0xff]  }
 0x628   : > { %v1780_v47 = vpack.c.bf16 %v1768_v22, %v1768_v22  ;;  %v1772_v28 = vpack.c.bf16 %v1262_v50, %v1262_v50 }
 0x629   : > { %v1932_v24 = vsel %vm1635_vm8, %v1779_v44, 0 }
 0x62a   : > { %3247 = vmatpush3.bf16.xpose.msra.mxu1 %v1932_v24  ;;  %v1935_v48 = vsel %vm1635_vm8, %v1780_v47, 0  ;;  %v3391_v24 = vld [vmem:[%s3729_s0] sm:$0xff]  }
 0x62b   : > { %3248 = vmatprep.subr.bf16.mxu1 %v3524_v32 }
 0x62e   : > { %3241 = vmatpush3.bf16.xpose.msra.mxu0 %v1886_v41 }
 0x62f   : > { %3254 = vmatprep.subr.bf16.mxu0 %v3389_v59 }
 0x632   : > { %3249 = vmatpush3.bf16.xpose.msra.mxu1 %v1935_v48 }
 0x633   : > { %3262 = vmatprep.subr.bf16.mxu1 %v3391_v24 }
 0x635   : > { %3243 = vmatmul.mubr.msk.bf16.vlgmr.msra.gmra.mrb[12].mxu0 %vm1635_vm8, %v1771_v49 }
 0x636   : > { %3255 = vmatpush3.bf16.msra.mxu0 %v3389_v59 }
 0x637   : > { %3256 = vmatprep.subr.bf16.mxu0 %v3390_v39 }
 0x639   : > { %3251 = vmatmul.mubr.msk.bf16.vlgmr.msra.gmra.mrb[24].mxu1 %vm1635_vm8, %v1772_v28 }
 0x63a   : > { %3257 = vmatpush3.bf16.msra.mxu0 %v3390_v39  ;;  %3263 = vmatpush3.bf16.msra.mxu1 %v3391_v24 }
 0x63b   : > { %3264 = vmatprep.subr.bf16.mxu1 %v3392_v45 }
 0x63e   : > { %3265 = vmatpush3.bf16.msra.mxu1 %v3392_v45 }
 0x6cf   : > { %v1824_v32 = vpop.f32.mrb[16].mxu1 }
 0x6d0   : > { %1977 = vxpose.xlu1.b32.start [1/4] (short) (narrow) %v1824_v32, 24  ;;  %v3228_v51 = vpop.f32.mrb[17].mxu1 }
 0x6d1   : > { %v1827_v52 = vpop.f32.mrb[18].mxu1  ;;  %v3071_v51 = vld [vmem:[%s4197_s26] ss:$0 sm:$0xff]  ;;  %s3530_s26 = smov (!%p3087_p8), 48  }
 0x6d2   : > { %v3229_v53 = vpop.f32.mrb[19].mxu1 }
 0x6df   : > { %v1873_v23 = vpop.f32.mrb[20].mxu1 }
 0x6e0   : > { %1978 = vxpose.xlu1.b32.cont [2/4] (short) (narrow) %v1873_v23, 24  ;;  %v3236_v54 = vpop.f32.mrb[21].mxu1 }
 0x6e1   : > { %v1876_v56 = vpop.f32.mrb[22].mxu1  ;;  %v3072_v54 = vld [vmem:[%s872_s28] ss:$0 sm:$0xff]  ;;  %s3531_s28 = smov (!%p3087_p8), 80  }
 0x6e2   : > { %v3237_v58 = vpop.f32.mrb[23].mxu1 }
 0x708   : > { %v1922_v61 = vpop.f32.mrb[12].mxu0 }
 0x709   : > { %1979 = vxpose.xlu1.b32.cont [3/4] (short) (narrow) %v1922_v61, 24  ;;  %v3244_v62 = vpop.f32.mrb[13].mxu0 }
 0x70a   : > { %v1925_v63 = vpop.f32.mrb[14].mxu0 }
 0x70b   : > { %v3245_v1 = vpop.f32.mrb[15].mxu0 }
 0x70c   : > { %v1971_v3 = vpop.f32.mrb[24].mxu1 }
 0x70d   : > { %1980 = vxpose.xlu1.b32.end [4/4] (short) (narrow) %v1971_v3, 24  ;;  %v3252_v4 = vpop.f32.mrb[25].mxu1 }
 0x70e   : > { %v1974_v5 = vpop.f32.mrb[26].mxu1  ;;  %v3393_v4 = vld [vmem:[%s3743_s18] sm:$0xff]  }
 0x70f   : > { %v3253_v60 = vpop.f32.mrb[27].mxu1  ;;  %3270 = vmatprep.subr.bf16.mxu0 %v3393_v4  ;;  %v3394_v5 = vld [vmem:[%s3743_s18 + $0x8] sm:$0xff]  }
 0x710   : > { %v3395_v60 = vld [vmem:[%s3743_s18 + $0x10] sm:$0xff]  }
 0x781   : > { %v1993_v55 = vpop.trf.xlu1 }
 0x785   : > { %v1994_v6 = vpop.trf.xlu1 }
 0x786   : > { %v2009_v57 = vpack.c.bf16 %v1994_v6, %v1993_v55  ;;  %v3396_v55 = vld [vmem:[%s3743_s18 + $0x18] sm:$0xff]   ;;  %v3397_v6 = vld [vmem:[%s3743_s18 + $0x20] sm:$0xff]  }
 0x788   : > { %3258 = vmatprep.mubr.msk.bf16.mxu0 %vm984_vm4, %v2009_v57  ;;  %v3398_v57 = vld [vmem:[%s3743_s18 + $0x28] sm:$0xff]  }
 0x789   : > { %v1995_v8 = vpop.trf.xlu1 }
 0x78a   : > { %v2010_v9 = vpack.c.bf16 %v1995_v8, %v1995_v8  ;;  %v3399_v8 = vld [vmem:[%s3743_s18 + $0x30] sm:$0xff]  }
 0x78c   : > { %3259 = vmatmul.mubr.msk.bf16.vlgmr.msra.gmra.mrb[16].mxu0 %vm984_vm4, %v2010_v9  ;;  %v3400_v9 = vld [vmem:[%s3743_s18 + $0x38] sm:$0xff]  }
 0x78d   : > { %3271 = vmatpush3.bf16.msra.mxu0 %v3393_v4 }
 0x78e   : > { %3272 = vmatprep.subr.bf16.mxu0 %v3394_v5 }
 0x791   : > { %3273 = vmatpush3.bf16.msra.mxu0 %v3394_v5 }
 0x792   : > { %3274 = vmatprep.subr.bf16.mxu0 %v3395_v60 }
 0x795   : > { %3275 = vmatpush3.bf16.msra.mxu0 %v3395_v60 }
 0x796   : > { %3276 = vmatprep.subr.bf16.mxu0 %v3396_v55 }
 0x799   : > { %3277 = vmatpush3.bf16.msra.mxu0 %v3396_v55 }
 0x79a   : > { %3278 = vmatprep.subr.bf16.mxu0 %v3397_v6 }
 0x79d   : > { %3279 = vmatpush3.bf16.msra.mxu0 %v3397_v6 }
 0x79e   : > { %3280 = vmatprep.subr.bf16.mxu0 %v3398_v57 }
 0x7a1   : > { %3281 = vmatpush3.bf16.msra.mxu0 %v3398_v57 }
 0x7a2   : > { %3282 = vmatprep.subr.bf16.mxu0 %v3399_v8 }
 0x7a5   : > { %3283 = vmatpush3.bf16.msra.mxu0 %v3399_v8 }
 0x7a6   : > { %3284 = vmatprep.subr.bf16.mxu0 %v3400_v9 }
 0x7a9   : > { %3285 = vmatpush3.bf16.msra.mxu0 %v3400_v9 }
 0x85f   : > { %v3260_v11 = vpop.f32.mrb[16].mxu0 }
 0x860   : > { %v2074_v12 = vpop.f32.mrb[17].mxu0  ;;  %v2083_v19 = vadd.f32 %v3260_v11, %v3066_v10 }
 0x861   : > { %v2075_v13 = vadd.f32 %v3066_v10, %v2074_v12  ;;  %v3261_v14 = vpop.f32.mrb[18].mxu0 }
 0x862   : > { %v2077_v7 = vpop.f32.mrb[19].mxu0  ;;  %v3994_v25 = vadd.f32 %v2083_v19, %v3773_v17 }
 0x863   : > { %v3986_v15 = vadd.f32 %v2075_v13, %v3771_v16  ;;  %v2078_v0 = vadd.f32 %v3066_v10, %v2077_v7  ;;  %v3073_v10 = vld [vmem:[%s4198_s5] ss:$0 sm:$0xff] }
 0x864   : > { %v2099_v16 = vsel %vm991_vm5, %v3994_v25, 0.0 }
 0x865   : > { %v3989_v21 = vadd.f32 %v2078_v0, %v3775_v18  ;;  %v2093_v2 = vsel %vm984_vm4, %v3986_v15, 0.0 }
 0x866   : > { %2094 = vadd.xlane.f32.xlu0 %v2093_v2 }
 0x867   : > { %v2096_v26 = vsel %vm984_vm4, %v3989_v21, 0.0 }
 0x86a   : > { %2097 = vadd.xlane.f32.xlu0 %v2096_v26 }
 0x86e   : > { %2100 = vadd.xlane.f32.xlu0 %v2099_v16 }
 0x8f3   : > { %v2095_v27 = vpop.xlane.xlu0 %2094 }
 0x8f4   : > { %v2102_v29 = vmul.f32 0.03125, %v2095_v27 }
 0x8f6   : > { %v2105_v18 = vsub.f32 %v3986_v15, %v2102_v29 }
 0x8f7   : > { %v2098_v33 = vpop.xlane.xlu0 %2097 }
 0x8f8   : > { %v2103_v34 = vmul.f32 0.03125, %v2098_v33  ;;  %v2108_v35 = vmul.f32 %v2105_v18, %v2105_v18 }
 0x8fa   : > { %v2106_v17 = vsub.f32 %v3989_v21, %v2103_v34  ;;  %v2111_v36 = vsel %vm984_vm4, %v2108_v35, 0.0 }
 0x8fb   : > { %2112 = vadd.xlane.f32.xlu0 %v2111_v36  ;;  %v2101_v37 = vpop.xlane.xlu0 %2100 }
 0x8fc   : > { %v2104_v38 = vmul.f32 0.03125, %v2101_v37  ;;  %v2109_v40 = vmul.f32 %v2106_v17, %v2106_v17 }
 0x8fe   : > { %v2107_v30 = vsub.f32 %v3994_v25, %v2104_v38  ;;  %v2114_v42 = vsel %vm984_vm4, %v2109_v40, 0.0 }
 0x8ff   : > { %2115 = vadd.xlane.f32.xlu0 %v2114_v42 }
 0x900   : > { %v2110_v43 = vmul.f32 %v2107_v30, %v2107_v30 }
 0x902   : > { %v2117_v44 = vsel %vm991_vm5, %v2110_v43, 0.0 }
 0x903   : > { %2118 = vadd.xlane.f32.xlu0 %v2117_v44 }
 0x988   : > { %v2113_v22 = vpop.xlane.xlu0 %2112 }
 0x989   : > { %v2120_v46 = vmul.f32 0.03125, %v2113_v22 }
 0x98b   : > { %v2123_v41 = vadd.f32 1e-06, %v2120_v46 }
 0x98c   : > { %v2116_v47 = vpop.xlane.xlu0 %2115 }
 0x98d   : > { %3455 = vrsqrt.f32 %v2123_v41  ;;  %v2121_v20 = vmul.f32 0.03125, %v2116_v47 }
 0x98f   : > { %v2124_v31 = vadd.f32 1e-06, %v2121_v20 }
 0x990   : > { %v2119_v48 = vpop.xlane.xlu0 %2118 }
 0x991   : > { %3457 = vrsqrt.f32 %v2124_v31  ;;  %v2122_v49 = vmul.f32 0.03125, %v2119_v48 }
 0x993   : > { %v2125_v50 = vadd.f32 1e-06, %v2122_v49 }
 0x995   : > { %3459 = vrsqrt.f32 %v2125_v50 }
 0x997   : > { %v3456_v28 = vpop.eup %3455 }
 0x998   : > { %v2129_v32 = vmul.f32 %v3456_v28, %v2105_v18  ;;  %v3078_v28 = vld [vmem:[%s888_s4] ss:$0 sm:$0xff] }
 0x99a   : > { %v2138_v23 = vmul.f32 %v3071_v51, %v2129_v32 }
 0x99b   : > { %v3458_v52 = vpop.eup %3457 }
 0x99c   : > { %v2130_v53 = vmul.f32 %v3458_v52, %v2106_v17  ;;  %v2147_v39 = vadd.f32 %v3072_v54, %v2138_v23 }
 0x99e   : > { %v2139_v56 = vmul.f32 %v3071_v51, %v2130_v53 }
 0x99f   : > { %v3460_v58 = vpop.eup %3459 }
 0x9a0   : > { %v2131_v59 = vmul.f32 %v3460_v58, %v2107_v30  ;;  %v2148_v61 = vadd.f32 %v3072_v54, %v2139_v56 }
 0x9a2   : > { %v2140_v62 = vmul.f32 %v3071_v51, %v2131_v59  ;;  %v2150_v63 = vpack.c.bf16 %v2148_v61, %v2147_v39 }
 0x9a4   : > { %3266 = vmatprep.mubr.msk.bf16.mxu1 %vm984_vm4, %v2150_v63  ;;  %v2149_v1 = vadd.f32 %v3072_v54, %v2140_v62 }
 0x9a6   : > { %v2151_v3 = vpack.c.bf16 %v2149_v1, %v2149_v1 }
 0x9a8   : > { %3267 = vmatmul.mubr.msk.bf16.vlgmr.msra.gmra.mrb[28].mxu1 %vm984_vm4, %v2151_v3 }
 0xa7b   : > { %v3268_v11 = vpop.f32.mrb[28].mxu1 }
 0xa7c   : > { %v2224_v12 = vadd.f32 %v3268_v11, %v3073_v10  ;;  %v2215_v13 = vpop.f32.mrb[29].mxu1 }
 0xa7d   : > { %v2216_v14 = vadd.f32 %v3073_v10, %v2215_v13  ;;  %v3269_v7 = vpop.f32.mrb[30].mxu1  ;;  %v2545_v13 = vld [vmem:[%s4201_s3 + $0x8] sm:$0x1] (!%p3087_p8) }
 0xa7e   : > { %v2231_v0 = vmul.f32 %v2224_v12, %v2224_v12  ;;  %v2218_v19 = vpop.f32.mrb[31].mxu1  ;;  %v3526_v7 = vmov (!%p3087_p8), 0  }
 0xa7f   : > { %v2229_v2 = vmul.f32 %v2216_v14, %v2216_v14  ;;  %v2219_v26 = vadd.f32 %v3073_v10, %v2218_v19  ;;  %3468 = vset.pattern.permute.xlu1 (!%p3087_p8), %v3526_v7  ;;  %3467 = vset.pattern.permute.xlu0 (!%p3087_p8), %v3526_v7 }
 0xa80   : > { %v2234_v16 = vmul.f32 %v2231_v0, %v2224_v12 }
 0xa81   : > { %v2232_v27 = vmul.f32 %v2229_v2, %v2216_v14  ;;  %v2230_v29 = vmul.f32 %v2219_v26, %v2219_v26 }
 0xa82   : > { %v2237_v18 = vmul.f32 0.044715, %v2234_v16 }
 0xa83   : > { %v2235_v33 = vmul.f32 0.044715, %v2232_v27  ;;  %v2233_v34 = vmul.f32 %v2230_v29, %v2219_v26 }
 0xa84   : > { %v2240_v35 = vadd.f32 %v2237_v18, %v2224_v12 }
 0xa85   : > { %v2238_v17 = vadd.f32 %v2235_v33, %v2216_v14  ;;  %v2236_v36 = vmul.f32 0.044715, %v2233_v34 }
 0xa86   : > { %v2243_v37 = vmul.f32 0.7978846, %v2240_v35  ;;  %v3088_v35 = vld [vmem:[%s4203_s29] ss:$0 sm:$0xff] (!%p3087_p8) }
 0xa87   : > { %v2241_v38 = vmul.f32 0.7978846, %v2238_v17  ;;  %v2239_v40 = vadd.f32 %v2236_v36, %v2219_v26 }
 0xa88   : > { %3461 = vtanh.f32 %v2243_v37 }
 0xa89   : > { %3463 = vtanh.f32 %v2241_v38  ;;  %v2242_v30 = vmul.f32 0.7978846, %v2239_v40 }
 0xa8b   : > { %3465 = vtanh.f32 %v2242_v30  ;;  %v3089_v30 = vld [vmem:[%s4204_s7] ss:$0 sm:$0xff] (!%p3087_p8) }
 0xa92   : > { %v3462_v42 = vpop.eup %3461 }
 0xa93   : > { %v3464_v43 = vpop.eup %3463  ;;  %v2249_v44 = vadd.f32 1.0, %v3462_v42 }
 0xa94   : > { %v2247_v24 = vadd.f32 1.0, %v3464_v43 }
 0xa95   : > { %v3466_v45 = vpop.eup %3465  ;;  %v2252_v22 = vmul.f32 0.5, %v2249_v44 }
 0xa96   : > { %v2248_v46 = vadd.f32 1.0, %v3466_v45  ;;  %v2250_v41 = vmul.f32 0.5, %v2247_v24 }
 0xa97   : > { %v2255_v20 = vmul.f32 %v2252_v22, %v2224_v12  ;;  %v2446_v12 = vld [vmem:[%s4200_s27] sm:$0xff] (!%p3087_p8) }
 0xa98   : > { %v2251_v47 = vmul.f32 0.5, %v2248_v46  ;;  %v2253_v31 = vmul.f32 %v2250_v41, %v2216_v14  ;;  %v2544_v14 = vld [vmem:[%s4202_s25] sm:$0xff] (!%p3087_p8) }
 0xa99   : > { %v2257_v50 = vpack.c.bf16 %v2255_v20, %v2255_v20 }
 0xa9a   : > { %v2254_v48 = vmul.f32 %v2251_v47, %v2219_v26 }
 0xa9c   : > { %v2256_v49 = vpack.c.bf16 %v2254_v48, %v2253_v31 }
 0xa9e   : > { %3286 = vmatprep.mubr.bf16.mxu0 %v2256_v49  ;;  %v2447_v49 = vld [vmem:[%s4200_s27 + $0x8] sm:$0x1] (!%p3087_p8) }
 0xa9f   : > { %3287 = vmatmul.mubr.bf16.vlgmr.msra.gmra.mrb[20].mxu0 %v2257_v50  ;;  %v3527_v50 = vmov (!%p3087_p8), 0.0  }
 0xaa0   : > { %3294 = vmatprep.mubr.msk.f32.mxu0 (!%p3087_p8), %vm984_vm4, %v2446_v12  ;;  %2773 = vst [vmem:[%s3748_s24 + $0x8] sm:$0xff] (!%p3087_p8), %v3527_v50  ;;  %2772 = vst [vmem:[%s3748_s24] sm:$0xff] (!%p3087_p8), %v3527_v50 }
 0xb72   : > { %v3288_v32 = vpop.f32.mrb[20].mxu0 }
 0xb73   : > { %v2372_v51 = vadd.f32 %v3288_v32, %v3078_v28  ;;  %v2363_v52 = vpop.f32.mrb[21].mxu0 }
 0xb74   : > { %v2364_v53 = vadd.f32 %v3078_v28, %v2363_v52  ;;  %v3289_v23 = vpop.f32.mrb[22].mxu0  ;;  %2386 = sbr.rel (%p3087_p8) target bundleno = 4094 (0xffe), region = 116 }
 0xb75   : > { %v2379_v54 = vadd.f32 %v2372_v51, %v3994_v25  ;;  %v2366_v56 = vpop.f32.mrb[23].mxu0 }
 0xb76   : > { %v2377_v58 = vadd.f32 %v2364_v53, %v3986_v15  ;;  %v2367_v59 = vadd.f32 %v3078_v28, %v2366_v56 }
 0xb77   : > { %2382 = vst.msk [vmem:[#allocation2 + $0x10] sm:$0x1] %vm991_vm5, %v2379_v54  ;;  %v2395_v62 = vsel (!%p3087_p8), %vm991_vm5, %v2379_v54, 0.0 }
 0xb78   : > { %2380 = vst.msk [vmem:[#allocation2] sm:$0xff] %vm984_vm4, %v2377_v58  ;;  %v2378_v39 = vadd.f32 %v2367_v59, %v3989_v21  ;;  %v2389_v61 = vsel (!%p3087_p8), %vm984_vm4, %v2377_v58, 0.0  ;;  %2396 = vadd.xlane.f32.xlu1 (!%p3087_p8), %v2395_v62 }
 0xb79   : > { %2390 = vadd.xlane.f32.xlu0 (!%p3087_p8), %v2389_v61 }
 0xb7a   : > { %2381 = vst.msk [vmem:[#allocation2 + $0x8] sm:$0xff] %vm984_vm4, %v2378_v39  ;;  %v2392_v15 = vsel (!%p3087_p8), %vm984_vm4, %v2378_v39, 0.0 }
 0xb7d   : > { %2393 = vadd.xlane.f32.xlu0 %v2392_v15 }
 0xc05   : > { %v2397_v63 = vpop.xlane.xlu1 %2396 }
 0xc06   : > { %v2391_v25 = vpop.xlane.xlu0 %2390  ;;  %v2400_v3 = vmul.f32 0.03125, %v2397_v63 }
 0xc07   : > { %v2398_v1 = vmul.f32 0.03125, %v2391_v25 }
 0xc08   : > { %v2403_v21 = vsub.f32 %v2379_v54, %v2400_v3 }
 0xc09   : > { %v2401_v4 = vsub.f32 %v2377_v58, %v2398_v1 }
 0xc0a   : > { %v2394_v5 = vpop.xlane.xlu0 %2393  ;;  %v2406_v6 = vmul.f32 %v2403_v21, %v2403_v21 }
 0xc0b   : > { %v2399_v60 = vmul.f32 0.03125, %v2394_v5  ;;  %v2404_v55 = vmul.f32 %v2401_v4, %v2401_v4 }
 0xc0c   : > { %v2413_v9 = vsel %vm991_vm5, %v2406_v6, 0.0  ;;  %vm2814_vm5 = vcmask 654720  }
 0xc0d   : > { %v2402_v57 = vsub.f32 %v2378_v39, %v2399_v60  ;;  %v2407_v8 = vsel %vm984_vm4, %v2404_v55, 0.0 }
 0xc0e   : > { %2408 = vadd.xlane.f32.xlu1 %v2407_v8 }
 0xc0f   : > { %v2405_v10 = vmul.f32 %v2402_v57, %v2402_v57 }
 0xc11   : > { %v2410_v11 = vsel %vm984_vm4, %v2405_v10, 0.0 }
 0xc12   : > { %2414 = vadd.xlane.f32.xlu1 %v2413_v9  ;;  %2411 = vadd.xlane.f32.xlu0 %v2410_v11 }
 0xc23   : > { %2553 = vperm.xlu1 %3468, %v2545_v13  }
 0xc28   : > { %2548 = vperm.xlu0 %3467, %v2544_v14  }
 0xc9b   : > { %v2409_v0 = vpop.xlane.xlu1 %2408 }
 0xc9c   : > { %v2416_v19 = vmul.f32 0.03125, %v2409_v0 }
 0xc9e   : > { %v2419_v2 = vadd.f32 1e-06, %v2416_v19 }
 0xc9f   : > { %v2415_v26 = vpop.xlane.xlu1 %2414  ;;  %v2412_v16 = vpop.xlane.xlu0 %2411 }
 0xca0   : > { %3469 = vrsqrt.f32 %v2419_v2  ;;  %v2418_v27 = vmul.f32 0.03125, %v2415_v26  ;;  %v2417_v29 = vmul.f32 0.03125, %v2412_v16 }
 0xca2   : > { %v2421_v18 = vadd.f32 1e-06, %v2418_v27  ;;  %v2420_v33 = vadd.f32 1e-06, %v2417_v29 }
 0xca3   : > { %v2554_v32 = vpop.permute.xlu1 %2553 }
 0xca4   : > { %3471 = vrsqrt.f32 %v2421_v18 }
 0xca5   : > { %3473 = vrsqrt.f32 %v2420_v33 }
 0xca7   : > { %v2549_v53 = vpop.permute.xlu0 %2548 }
 0xcaa   : > { %v3470_v34 = vpop.eup %3469 }
 0xcab   : > { %v2425_v17 = vmul.f32 %v3470_v34, %v2401_v4 }
 0xcad   : > { %v2434_v37 = vmul.f32 %v3088_v35, %v2425_v17  ;;  %v2676_v17 = vld [vmem:[%s4205_s19] sm:$0xff] }
 0xcae   : > { %v3472_v36 = vpop.eup %3471 }
 0xcaf   : > { %v3474_v38 = vpop.eup %3473  ;;  %v2427_v40 = vmul.f32 %v3472_v36, %v2403_v21  ;;  %v2443_v24 = vadd.f32 %v3089_v30, %v2434_v37 }
 0xcb0   : > { %v2426_v42 = vmul.f32 %v3474_v38, %v2402_v57 }
 0xcb1   : > { %v2436_v43 = vmul.f32 %v3088_v35, %v2427_v40  ;;  %v2452_v41 = vrot.slane %v2443_v24, 1 }
 0xcb2   : > { %v2435_v44 = vmul.f32 %v3088_v35, %v2426_v42 }
 0xcb3   : > { %v2445_v45 = vadd.f32 %v3089_v30, %v2436_v43 }
 0xcb4   : > { %v2444_v22 = vadd.f32 %v3089_v30, %v2435_v44  ;;  %v2673_v44 = vld [vmem:[%s4206_s23 + $0x8] sm:$0x1] }
 0xcb5   : > { %v2455_v46 = vrot.slane %v2445_v45, 1 }
 0xcb6   : > { %v2453_v47 = vrot.slane %v2444_v22, 1  ;;  %v2672_v22 = vld [vmem:[%s4206_s23] sm:$0xff] }
 0xcb8   : > { %v2454_v20 = vsel %vm2451_vm11, %v2452_v41, %v2453_v47  ;;  %v2456_v31 = vsel %vm2451_vm11, %v2453_v47, %v2455_v46 }
 0xcb9   : > { %v3309_v48 = vpack.c.bf16 %v2456_v31, %v2454_v20  ;;  %v2677_v20 = vld [vmem:[%s4205_s19 + $0x8] sm:$0xff] }
 0xcbb   : > { %3311 = vmatprep.subr.msk.bf16.mxu0 %vm3310_vm12, %v3309_v48  ;;  %3316 = vmatprep.subr.bf16.mxu1 %v3309_v48 }
 0xcbc   : > { %3314 = vmatpush3.bf16.xpose.msk.msra.mxu0 %vm3310_vm12, %v3309_v48  ;;  %3318 = vmatpush3.bf16.msra.mxu1 %v3309_v48 }
 0xcc3   : > { %3295 = vmatmul.mubr.msk.f32.vlgmr.msra.gmra.mrb[0].mxu0 %vm984_vm4, %v2447_v49 }
 0xd96   : > { %v3296_v28 = vpop.f32.mrb[0].mxu0 }
 0xd97   : > { %v2543_v51 = vmul.f32 2.0, %v3296_v28  ;;  %2775 = vst.msk [vmem:[%s3748_s24 + $0x8] sm:$0x1] %vm2560_vm13, %v3296_v28  ;;  %v2533_v52 = vpop.f32.mrb[1].mxu0 }
 0xd98   : > { %v2542_v23 = vmul.f32 2.0, %v2533_v52  ;;  %2774 = vst.msk [vmem:[%s3748_s24] sm:$0xff] %vm2558_vm14, %v2533_v52 }
 0xd99   : > { %v2557_v54 = vsub.f32 %v2543_v51, %v2554_v32 }
 0xd9a   : > { %v2556_v56 = vsub.f32 %v2542_v23, %v2549_v53 }
 0xd9b   : > { %v2561_v58 = vsel %vm2560_vm13, %v2557_v54, -inf }
 0xd9c   : > { %v2559_v59 = vsel %vm2558_vm14, %v2556_v56, -inf }
 0xd9d   : > { %v2562_v39 = vmax.f32 %v2559_v59, %v2561_v58 }
 0xd9f   : > { %v2563_v61 = vrot.slane %v2562_v39, 4 }
 0xda1   : > { %v2564_v62 = vmax.f32 %v2562_v39, %v2563_v61 }
 0xda3   : > { %v2565_v15 = vrot.slane %v2564_v62, 2 }
 0xda5   : > { %v2566_v25 = vmax.f32 %v2564_v62, %v2565_v15 }
 0xda7   : > { %v2567_v63 = vrot.slane %v2566_v25, 1 }
 0xda9   : > { %v2568_v1 = vmax.f32 %v2566_v25, %v2567_v63 }
 0xdab   : > { %v2569_v3 = vsub.f32 %v2556_v56, %v2568_v1  ;;  %v2570_v4 = vsub.f32 %v2557_v54, %v2568_v1 }
 0xdad   : > { %v2571_v21 = vmul.f32 1.442695, %v2569_v3  ;;  %v2573_v5 = vmul.f32 1.442695, %v2570_v4 }
 0xdaf   : > { %3475 = vpow2.f32 %v2571_v21 }
 0xdb0   : > { %3477 = vpow2.f32 %v2573_v5 }
 0xdb9   : > { %v3476_v60 = vpop.eup %3475 }
 0xdba   : > { %v3478_v55 = vpop.eup %3477  ;;  %v2575_v6 = vsel %vm2558_vm14, %v3476_v60, 0.0 }
 0xdbb   : > { %v2576_v57 = vsel %vm2560_vm13, %v3478_v55, 0.0 }
 0xdbc   : > { %v2577_v8 = vadd.f32 %v2576_v57, %v2575_v6 }
 0xdbe   : > { %v2578_v9 = vrot.slane %v2577_v8, 4 }
 0xdc0   : > { %v2579_v10 = vadd.f32 %v2578_v9, %v2577_v8 }
 0xdc2   : > { %v2580_v11 = vrot.slane %v2579_v10, 2 }
 0xdc4   : > { %v2581_v12 = vadd.f32 %v2580_v11, %v2579_v10 }
 0xdc6   : > { %v2582_v13 = vrot.slane %v2581_v12, 1 }
 0xdc8   : > { %v2583_v14 = vadd.f32 %v2582_v13, %v2581_v12 }
 0xdca   : > { %3479 = vrcp.f32 %v2583_v14 }
 0xdd4   : > { %v3480_v7 = vpop.eup %3479 }
 0xdd5   : > { %v2585_v0 = vmul.f32 %v3480_v7, %v3476_v60  ;;  %v2586_v19 = vmul.f32 %v3480_v7, %v3478_v55 }
 0xdd7   : > { %2776 = vrot.lane.b32.xlu1 %v2585_v0, %s3528_s30  ;;  %v2762_v2 = vsel %vm2558_vm14, %v2585_v0, 0.0  ;;  %3301 = vmatprep.mubr.msk.f32.mxu1 %vm2558_vm14, %v2585_v0 }
 0xdd8   : > { %v2763_v26 = vrot.slane %v2762_v2, 4  ;;  %3302 = vmatmul.mubr.msk.f32.vlgmr.msra.gmra.mrb[0].mxu1 %vm2558_vm14, %v2586_v19 }
 0xdd9   : > { %3306 = vmatprep.mubr.msk.f32.mxu1 %vm984_vm4, %v2676_v17 }
 0xdda   : > { %v2764_v16 = vadd.f32 %v2763_v26, %v2762_v2 }
 0xddb   : > { %2778 = vrot.lane.b32.xlu1 %v2586_v19, %s3528_s30 }
 0xddc   : > { %v2765_v27 = vrot.slane %v2764_v16, 2 }
 0xdde   : > { %v2766_v29 = vadd.f32 %v2765_v27, %v2764_v16 }
 0xddf   : > { %2803 = vrot.lane.b32.xlu1 %v2586_v19, %s3529_s1 }
 0xde0   : > { %v2767_v18 = vrot.slane %v2766_v29, 1 }
 0xde2   : > { %v2768_v33 = vadd.f32 %v2767_v18, %v2766_v29 }
 0xde4   : > { %2799 = vrot.lane.b32.xlu1 %v2768_v33, %s3529_s1  ;;  %vm2769_vm15 = vcmp.ge.f32.partialorder %v2768_v33, %v2586_v19 }
 0xde5   : > { %v3099_v34 = vsel %vm2769_vm15, 1.0, %v3527_v50 }
 0xde6   : > { %v2792_v35 = vsub.f32 1.0, %v3099_v34 }
 0xde8   : > { %2787 = vrot.lane.b32.xlu1 %v3099_v34, %s3529_s1 }
 0xdec   : > { %2794 = vrot.lane.b32.xlu1 %v2792_v35, %s3529_s1 }
 0xe49   : > { %v2777_v36 = vpop.permute.xlu1 %2776 }
 0xe4a   : > { %2783 = vst.msk [vmem:[%s3748_s24] sm:$0xff] %vm2782_vm0, %v2777_v36 }
 0xe4d   : > { %v2779_v37 = vpop.permute.xlu1 %2778 }
 0xe4e   : > { %2785 = vst.msk [vmem:[%s3748_s24 + $0x8] sm:$0x1] %vm2784_vm1, %v2779_v37 }
 0xe51   : > { %v2804_v38 = vpop.permute.xlu1 %2803 }
 0xe52   : > { %2806 = vst.msk [vmem:[%s3748_s24 + $0x3] sm:$0x1] %vm2790_vm2, %v2804_v38 }
 0xe56   : > { %v2800_v40 = vpop.permute.xlu1 %2799 }
 0xe57   : > { %2802 = vst.msk [vmem:[%s3748_s24 + $0x2] sm:$0x1] %vm2790_vm2, %v2800_v40 }
 0xe5a   : > { %v2788_v30 = vpop.permute.xlu1 %2787 }
 0xe5b   : > { %2791 = vst.msk [vmem:[%s3748_s24] sm:$0x1] %vm2790_vm2, %v2788_v30 }
 0xe5e   : > { %v2795_v42 = vpop.permute.xlu1 %2794 }
 0xe5f   : > { %2797 = vst.msk [vmem:[%s3748_s24 + $0x1] sm:$0x1] %vm2790_vm2, %v2795_v42 }
 0xeab   : > { %v3303_v43 = vpop.f32.mrb[0].mxu1 }
 0xeac   : > { %v2671_v24 = vmul.f32 0.0625, %v3303_v43  ;;  %v2661_v45 = vpop.f32.mrb[1].mxu1 }
 0xead   : > { %v2670_v46 = vmul.f32 0.0625, %v2661_v45 }
 0xeae   : > { %v2675_v41 = vmul.f32 %v2673_v44, %v2671_v24 }
 0xeaf   : > { %v2674_v47 = vmul.f32 %v2672_v22, %v2670_v46 }
 0xeb0   : > { %2810 = vrot.lane.b32.xlu0 %v2675_v41, %s3530_s26 }
 0xeb1   : > { %2808 = vrot.lane.b32.xlu1 %v2674_v47, %s3530_s26  ;;  %3304 = vmatprep.subr.msk.mxu1 %vm984_vm4, %v2674_v47 }
 0xeb2   : > { %3305 = vmatpush3.xpose.msk.msra.mxu1 %vm984_vm4, %v2674_v47 }
 0xeb5   : > { %3307 = vmatmul.mubr.msk.f32.vlgmr.msra.gmra.mrb[2].mxu1 %vm984_vm4, %v2677_v20 }
 0xf22   : > { %v2811_v31 = vpop.permute.xlu0 %2810 }
 0xf23   : > { %2817 = vst.msk [vmem:[%s3748_s24 + $0x8] sm:$0x1] %vm2816_vm3, %v2811_v31  ;;  %v2809_v48 = vpop.permute.xlu1 %2808 }
 0xf24   : > { %2815 = vst.msk [vmem:[%s3748_s24] sm:$0xff] %vm2814_vm5, %v2809_v48 }
 0xf88   : > { %v3308_v49 = vpop.f32.mrb[2].mxu1 }
 0xf89   : > { %v2753_v50 = vpop.f32.mrb[3].mxu1  ;;  %2822 = vrot.lane.b32.xlu0 %v3308_v49, %s3531_s28 }
 0xf8a   : > { %2820 = vrot.lane.b32.xlu1 %v2753_v50, %s3531_s28 }
 0xffb   : > { %v2823_v28 = vpop.permute.xlu0 %2822 }
 0xffc   : > { %2828 = vst.msk [vmem:[%s3748_s24 + $0x8] sm:$0xff] %vm2826_vm6, %v2823_v28  ;;  %v2821_v32 = vpop.permute.xlu1 %2820 }
 0xffd   : > { %2827 = vst.msk [vmem:[%s3748_s24] sm:$0xff] %vm2826_vm6, %v2821_v32 }
 0xffe PF: > { %s4207_s7 = sld [smem:[#allocation6_spill]]  ;;  %s4208_s3 = sld [smem:[#allocation4_spill]] }
 0xfff   : > { %s4209_s28 = sld [smem:[#allocation5_spill]]  ;;  %s4210_s29 = sld [smem:[#allocation7_spill]] }
0x1000   : > { %s4211_s30 = sld [smem:[#allocation8_spill]] }
0x1004   : > { %s32_s4 = sadd.s32 1, %s4207_s7  }
0x1005   : > { %p29_p9 = scmp.ge.s32.totalorder %s32_s4, 6  }
0x1007   :  { %31 = sbr.rel (!%p29_p9) target bundleno = 15 (0xf), region = 182 }

</bundles_post_ra>
